<compile_context>
chip_gen: v5e
topology: v5e:2x2
jax: 0.10.0
libtpu: 0.0.40
codegen_flags: <defaults>
</compile_context>

<pallas_src>
import functools

import jax
import jax.numpy as jnp
from jax.experimental import pallas as pl
from jax.experimental.pallas import tpu as pltpu

BN_EPS = 1e-5
LANE = 128


def _round_up(x, m):
    return (x + m - 1) // m * m


def _vmem_limit_bytes():
    """Generation-aware VMEM limit (v5e/v6e: 128 MiB physical, v7x: 64 MiB)."""
    cap = 64 * 1024 * 1024
    try:
        cap = int(pltpu.get_tpu_info().vmem_capacity_bytes)
    except Exception:
        pass
    return min(cap * 3 // 4, 96 * 1024 * 1024)


def _pick_tile_h(N, H, W, C, Cop, vmem_budget):
    """Largest divisor of H whose accounted VMEM footprint fits the budget."""
    c_lane = _round_up(C, LANE)
    k_lane = _round_up(9 * C, LANE)
    wp_sub = _round_up(W + 2, 8)
    w_sub = _round_up(W, 8)

    fixed = 2 * _round_up(9 * C, 8) * Cop * 2          # bf16 weight, double-buffered
    fixed += 2 * 2 * 8 * Cop * 4                        # BN scale/bias
    fixed += 4 * 2 * wp_sub * c_lane * 4                # two 1-row halos, dbl-buffered

    def usage(t):
        p_sub = _round_up(t * W, 8)
        u = fixed
        u += 2 * t * wp_sub * c_lane * 4                # body input (dbl-buffered f32)
        u += 2 * t * w_sub * Cop * 4                    # output    (dbl-buffered f32)
        u += p_sub * k_lane * 2                         # im2col LHS (bf16)
        u += (t + 2) * wp_sub * c_lane * 2              # spike halo (bf16)
        u += 2 * p_sub * Cop * 4                        # matmul result + epilogue temp
        u += t * w_sub * Cop * 4                        # channel-padded residual
        return u

    m_cap = max(1, 4096 // W)                           # keep MXU M dimension sane
    h_cap = H if N >= 2 else max(1, H // 2)             # >=2 grid steps for v7x 2 TCs
    best = 1
    for t in range(1, H + 1):
        if H % t == 0 and t <= m_cap and t <= h_cap and usage(t) <= vmem_budget:
            best = t
    return best


def basic_block_kernel(scal_ref, x_body_ref, x_top_ref, x_bot_ref, w_ref,
                       scale_ref, bias_ref, out_ref, *, W, C, if_spike):
    """One (batch-image, row-tile) output block.

    scal_ref  : SMEM (2,) f32   [spike_cut = hoyer_thr*x_thr_scale*thr, 1/thr]
    x_body_ref: VMEM (1, tile_h, W+2, C) f32  this tile's own rows (W zero-padded)
    x_top_ref : VMEM (1, 1, W+2, C) f32       row above the tile (clamped at image top)
    x_bot_ref : VMEM (1, 1, W+2, C) f32       row below the tile (clamped at image bot)
    w_ref     : VMEM (9*C, Cop) bf16          conv3x3 weight, K = (kh, kw, ci) fused
    scale_ref : VMEM (1, Cop) f32             folded BN scale
    bias_ref  : VMEM (1, Cop) f32             folded BN bias
    out_ref   : VMEM (1, tile_h, W, Cop) f32
    """
    cut = scal_ref[0]
    inv_thr = scal_ref[1]
    _, tile_h, _, _ = x_body_ref.shape
    cop = out_ref.shape[-1]
    p = tile_h * W
    h = pl.program_id(1)
    n_h = pl.num_programs(1)

    x_body = x_body_ref[0]                               # (tile_h, W+2, C) f32
    x_top = x_top_ref[0]                                 # (1, W+2, C) f32
    x_bot = x_bot_ref[0]                                 # (1, W+2, C) f32

    def to_spike(x):
        if if_spike:
            # Hoyer binary spike: one compare against the pre-folded scalar; cast to
            # bf16 once (lossless: spikes are exactly 0/1).  Compare stays f32 (v5e
            # has no bf16 VPU path).
            return (x > cut).astype(jnp.bfloat16)
        # TODO(synk): exact non-spiking HoyerBiAct path unknown; pass x/thr (this
        # branch is lossy at the MXU's bf16 input, unlike the 0/1 spike path).
        return (x * inv_thr).astype(jnp.bfloat16)

    s_body = to_spike(x_body)
    # The halo rows are clamped duplicates at the image edges; the true conv-pad rows
    # are zeros, whose spike is 0 (spike_cut >= 0), so mask them to 0 there.
    s_top = jnp.where(h == 0, jnp.zeros_like(x_top, dtype=jnp.bfloat16), to_spike(x_top))
    s_bot = jnp.where(h == n_h - 1,
                      jnp.zeros_like(x_bot, dtype=jnp.bfloat16), to_spike(x_bot))
    spk = jnp.concatenate([s_top, s_body, s_bot], axis=0)  # (tile_h+2, W+2, C) bf16

    # im2col with fused contraction K = 9*C -> single MXU matmul, internal f32 accum.
    taps = []
    for dy in range(3):
        for dx in range(3):
            taps.append(spk[dy:dy + tile_h, dx:dx + W, :].reshape(p, C))
    lhs = jnp.concatenate(taps, axis=-1)                  # (P, 9*C) bf16
    out2d = jnp.dot(lhs, w_ref[...], preferred_element_type=jnp.float32)  # (P, Cop)

    # Folded BN, then residual add (f32, exact) in 3-D shape.
    out2d = out2d * scale_ref[...] + bias_ref[...]
    out3 = out2d.reshape(tile_h, W, cop)
    residual = x_body[:, 1:1 + W, :]                      # (tile_h, W, C) f32
    if C == cop:
        out3 = out3 + residual
    else:
        zpad = jnp.zeros((tile_h, W, cop - C), jnp.float32)
        out3 = out3 + jnp.concatenate([residual, zpad], axis=-1)
    out_ref[0] = out3


def basic_block_forward(x_nchw, T, params, *, x_thr_scale=1.0, if_spike=True):
    """x_nchw: (N, C, H, W) float32. Returns (N, C, H, W) float32."""
    del T  # TODO(synk): multi-step HoyerBiAct dynamics not modeled (see header).
    N, C, H, W = x_nchw.shape
    w_oihw = params["conv_w"]
    Co = w_oihw.shape[0]
    assert Co == C, "residual add requires inplanes == planes (downsample=None)"
    assert w_oihw.shape[1] == C and w_oihw.shape[2:] == (3, 3)

    # NOTE: act_threshold must be > 0 (the reference divides by it); the folded
    # compare below is only equivalent under that assumption.
    thr = jnp.asarray(params["act_threshold"], jnp.float32)

    x_f32 = x_nchw.astype(jnp.float32)

    # ---- global Hoyer threshold: a global reduction, so it is hoisted out of the
    #      tiled kernel and computed on the ORIGINAL NCHW tensor (fusable upstream).
    #      For thr > 0: clip(x,0,thr) == thr*clip(x/thr,0,1)
    #        => hoyer_thr = sum(c^2) / (thr * sum(c))   (abs dropped: c >= 0).
    #      Degenerate all-nonpositive case returns 0 (reference would produce NaN).
    c = jnp.clip(x_f32, 0.0, thr)
    sum_sq = jnp.sum(c * c)
    sum_c = jnp.sum(c)
    hoyer_thr = jnp.where(sum_c > 0.0, sum_sq / (thr * sum_c), jnp.float32(0.0))
    spike_cut = hoyer_thr * jnp.float32(x_thr_scale) * thr   # spike = (x > spike_cut)
    scalars = jnp.stack([spike_cut, 1.0 / thr]).astype(jnp.float32)   # SMEM (2,)

    # ---- NHWC + width-only zero pad (one fused copy); the H halo is handled
    #      in-kernel via clamped 1-row halo blocks, channels stay unpadded in HBM.
    x_nhwc = jnp.transpose(x_f32, (0, 2, 3, 1))                       # (N, H, W, C)
    x_wpad = jnp.pad(x_nhwc, ((0, 0), (0, 0), (1, 1), (0, 0)))        # (N, H, W+2, C)

    Cop = _round_up(Co, LANE)   # lane-dense (unmasked) output stores

    # conv weight OIHW -> fused-K (kh*kw*ci, co), co zero-padded, bf16 for the MXU
    # (only the weight is rounded; the 0/1 spike activation is exact in bf16).
    w_k = jnp.transpose(w_oihw.astype(jnp.float32), (2, 3, 1, 0)).reshape(9 * C, Co)
    w_k = jnp.pad(w_k, ((0, 0), (0, Cop - Co))).astype(jnp.bfloat16)

    # Fold BN (inference) into scale/bias:  y = conv * scale + bias
    scale = params["bn_gamma"] * jax.lax.rsqrt(params["bn_var"] + BN_EPS)
    bias = params["bn_beta"] - params["bn_mean"] * scale
    scale = jnp.pad(scale.astype(jnp.float32), (0, Cop - Co)).reshape(1, Cop)
    bias = jnp.pad(bias.astype(jnp.float32), (0, Cop - Co)).reshape(1, Cop)

    vmem_limit = _vmem_limit_bytes()
    tile_h = _pick_tile_h(N, H, W, C, Cop, int(vmem_limit * 0.6))
    grid = (N, H // tile_h)

    kernel = functools.partial(basic_block_kernel, W=W, C=C, if_spike=if_spike)

    body_spec = pl.BlockSpec((1, tile_h, W + 2, C), lambda n, h: (n, h, 0, 0))
    # 1-row halo blocks: block size 1 along rows => block index == element row index.
    top_spec = pl.BlockSpec(
        (1, 1, W + 2, C), lambda n, h: (n, jnp.maximum(h * tile_h - 1, 0), 0, 0))
    bot_spec = pl.BlockSpec(
        (1, 1, W + 2, C), lambda n, h: (n, jnp.minimum(h * tile_h + tile_h, H - 1), 0, 0))

    out_nhwc = pl.pallas_call(
        kernel,
        out_shape=jax.ShapeDtypeStruct((N, H, W, Cop), jnp.float32),
        grid=grid,
        in_specs=[
            pl.BlockSpec(memory_space=pltpu.MemorySpace.SMEM),        # folded scalars
            body_spec,                                                # tile rows
            top_spec,                                                 # halo row above
            bot_spec,                                                 # halo row below
            pl.BlockSpec((9 * C, Cop), lambda n, h: (0, 0)),          # fused-K weight
            pl.BlockSpec((1, Cop), lambda n, h: (0, 0)),              # bn scale
            pl.BlockSpec((1, Cop), lambda n, h: (0, 0)),              # bn bias
        ],
        out_specs=pl.BlockSpec((1, tile_h, W, Cop), lambda n, h: (n, h, 0, 0)),
        compiler_params=pltpu.CompilerParams(
            dimension_semantics=("parallel", "parallel"),
            vmem_limit_bytes=vmem_limit,
        ),
    )(scalars, x_wpad, x_wpad, x_wpad, w_k, scale, bias)

    # TODO(synk): if the next BasicBlock consumes this, keep padded NHWC across blocks
    # instead of slicing + transposing back every block (saves two HBM passes/block).
    out_nhwc = out_nhwc[..., :Co]                          # strip channel padding
    return jnp.transpose(out_nhwc, (0, 3, 1, 2))           # NHWC -> NCHW


def _reference_forward(x_nchw, params, *, x_thr_scale=1.0):
    """Pure-JAX reference of the BasicBlock forward (f32 everywhere)."""
    thr = jnp.asarray(params["act_threshold"], jnp.float32)
    xs = x_nchw.astype(jnp.float32) / thr
    cl = jnp.clip(xs, 0.0, 1.0)
    hoyer = jnp.sum(cl * cl) / jnp.sum(jnp.abs(cl))
    spk = (xs > hoyer * x_thr_scale).astype(jnp.float32)
    conv = jax.lax.conv_general_dilated(
        spk, params["conv_w"].astype(jnp.float32), window_strides=(1, 1),
        padding=((1, 1), (1, 1)), dimension_numbers=("NCHW", "OIHW", "NCHW"))
    inv = jax.lax.rsqrt(params["bn_var"] + BN_EPS)
    sc = (params["bn_gamma"] * inv)[None, :, None, None]
    bn = (conv - params["bn_mean"][None, :, None, None]) * sc \
        + params["bn_beta"][None, :, None, None]
    return bn + x_nchw


def init_params(key, inplanes, planes):
    k1, k2, k3, k4, k5 = jax.random.split(key, 5)
    return {
        # conv3x3: (planes, inplanes, 3, 3), bias=False
        "conv_w": 0.1 * jax.random.normal(k1, (planes, inplanes, 3, 3), jnp.float32),
        # BatchNorm2d(planes): affine + running stats (inference mode)
        "bn_gamma": 1.0 + 0.1 * jax.random.normal(k2, (planes,), jnp.float32),
        "bn_beta": 0.1 * jax.random.normal(k3, (planes,), jnp.float32),
        "bn_mean": 0.05 * jax.random.normal(k4, (planes,), jnp.float32),
        "bn_var": 0.5 + jnp.abs(jax.random.normal(k5, (planes,), jnp.float32)),
        # HoyerBiAct learnable scalar threshold, init 1.0 (must stay > 0)
        "act_threshold": jnp.float32(1.0),
    }


if __name__ == "__main__":
    key = jax.random.PRNGKey(0)
    k_x, k_p = jax.random.split(key)

    N, C, H, W = 2, 4, 16, 16     # inplanes = planes = 4, stride = 1, downsample = None
    T = 2

    x = jax.random.normal(k_x, (N, C, H, W), jnp.float32)
    params = init_params(k_p, C, C)

    fwd = jax.jit(basic_block_forward, static_argnums=(1,))
    out = fwd(x, T, params)
    jax.block_until_ready(out)

    assert out.shape == (N, C, H, W) and out.dtype == jnp.float32

    ref = _reference_forward(x, params)
    max_err = float(jnp.max(jnp.abs(out - ref)))
    assert jnp.allclose(out, ref, rtol=5e-2, atol=5e-2), (
        f"mismatch vs reference, max abs err = {max_err}")

    print("KERNEL_OK")
</pallas_src>

<mosaic_0001>
module attributes {stable_mosaic.version = 11 : i64} {
  func.func @basic_block_kernel(%arg0: i32, %arg1: i32, %arg2: memref<2xf32, #tpu.memory_space<smem>>, %arg3: memref<1x16x18x4xf32, #tpu.memory_space<vmem>>, %arg4: memref<1x1x18x4xf32, #tpu.memory_space<vmem>>, %arg5: memref<1x1x18x4xf32, #tpu.memory_space<vmem>>, %arg6: memref<36x128xbf16, #tpu.memory_space<vmem>>, %arg7: memref<1x128xf32, #tpu.memory_space<vmem>>, %arg8: memref<1x128xf32, #tpu.memory_space<vmem>>, %arg9: memref<1x16x16x128xf32, #tpu.memory_space<vmem>>) attributes {dimension_semantics = [#tpu.dimension_semantics<parallel>, #tpu.dimension_semantics<parallel>], iteration_bounds = array<i64: 2, 1>, scalar_prefetch = 0 : i64, scratch_operands = 0 : i64, tpu.core_type = #tpu.core_type<tc>, window_params = [{transform_indices = @transform_0, window_bounds = array<i64: 2>}, {transform_indices = @transform_1, window_bounds = array<i64: 1, 16, 18, 4>}, {transform_indices = @transform_2, window_bounds = array<i64: 1, 1, 18, 4>}, {transform_indices = @transform_3, window_bounds = array<i64: 1, 1, 18, 4>}, {pipeline_mode = #tpu.pipeline_mode<synchronous>, transform_indices = @transform_4, window_bounds = array<i64: 36, 128>}, {pipeline_mode = #tpu.pipeline_mode<synchronous>, transform_indices = @transform_5, window_bounds = array<i64: 1, 128>}, {pipeline_mode = #tpu.pipeline_mode<synchronous>, transform_indices = @transform_6, window_bounds = array<i64: 1, 128>}, {transform_indices = @transform_7, window_bounds = array<i64: 1, 16, 16, 128>}]} {
    %c0 = arith.constant 0 : index
    %0 = memref.load %arg2[%c0] : memref<2xf32, #tpu.memory_space<smem>>
    %c0_0 = arith.constant 0 : index
    %c0_1 = arith.constant 0 : index
    %c0_2 = arith.constant 0 : index
    %c0_3 = arith.constant 0 : index
    %1 = vector.load %arg3[%c0_0, %c0_1, %c0_2, %c0_3] : memref<1x16x18x4xf32, #tpu.memory_space<vmem>>, vector<1x16x18x4xf32>
    %2 = vector.shape_cast %1 : vector<1x16x18x4xf32> to vector<16x18x4xf32>
    %c0_4 = arith.constant 0 : index
    %c0_5 = arith.constant 0 : index
    %c0_6 = arith.constant 0 : index
    %c0_7 = arith.constant 0 : index
    %3 = vector.load %arg4[%c0_4, %c0_5, %c0_6, %c0_7] : memref<1x1x18x4xf32, #tpu.memory_space<vmem>>, vector<1x1x18x4xf32>
    %4 = vector.shape_cast %3 : vector<1x1x18x4xf32> to vector<1x18x4xf32>
    %c0_8 = arith.constant 0 : index
    %c0_9 = arith.constant 0 : index
    %c0_10 = arith.constant 0 : index
    %c0_11 = arith.constant 0 : index
    %5 = vector.load %arg5[%c0_8, %c0_9, %c0_10, %c0_11] : memref<1x1x18x4xf32, #tpu.memory_space<vmem>>, vector<1x1x18x4xf32>
    %6 = vector.shape_cast %5 : vector<1x1x18x4xf32> to vector<1x18x4xf32>
    %7 = vector.broadcast %0 : f32 to vector<16x18x4xf32>
    %8 = arith.cmpf ogt, %2, %7 : vector<16x18x4xf32>
    %9 = arith.extui %8 : vector<16x18x4xi1> to vector<16x18x4xi32>
    %10 = arith.sitofp %9 : vector<16x18x4xi32> to vector<16x18x4xf32>
    %11 = arith.truncf %10 : vector<16x18x4xf32> to vector<16x18x4xbf16>
    %c0_i32 = arith.constant 0 : i32
    %12 = arith.cmpi eq, %arg1, %c0_i32 : i32
    %cst = arith.constant 0.000000e+00 : bf16
    %13 = vector.broadcast %cst : bf16 to vector<1x18x4xbf16>
    %14 = vector.broadcast %0 : f32 to vector<1x18x4xf32>
    %15 = arith.cmpf ogt, %4, %14 : vector<1x18x4xf32>
    %16 = arith.extui %15 : vector<1x18x4xi1> to vector<1x18x4xi32>
    %17 = arith.sitofp %16 : vector<1x18x4xi32> to vector<1x18x4xf32>
    %18 = arith.truncf %17 : vector<1x18x4xf32> to vector<1x18x4xbf16>
    %19 = arith.select %12, %13, %18 : vector<1x18x4xbf16>
    %c0_i32_12 = arith.constant 0 : i32
    %20 = arith.cmpi eq, %arg1, %c0_i32_12 : i32
    %cst_13 = arith.constant 0.000000e+00 : bf16
    %21 = vector.broadcast %cst_13 : bf16 to vector<1x18x4xbf16>
    %22 = vector.broadcast %0 : f32 to vector<1x18x4xf32>
    %23 = arith.cmpf ogt, %6, %22 : vector<1x18x4xf32>
    %24 = arith.extui %23 : vector<1x18x4xi1> to vector<1x18x4xi32>
    %25 = arith.sitofp %24 : vector<1x18x4xi32> to vector<1x18x4xf32>
    %26 = arith.truncf %25 : vector<1x18x4xf32> to vector<1x18x4xbf16>
    %27 = arith.select %20, %21, %26 : vector<1x18x4xbf16>
    %28 = tpu.concatenate %19, %11, %27 in 0 : vector<1x18x4xbf16>, vector<16x18x4xbf16>, vector<1x18x4xbf16> -> vector<18x18x4xbf16>
    %29 = vector.extract_strided_slice %28 {offsets = [0, 0, 0], sizes = [16, 16, 4], strides = [1, 1, 1]} : vector<18x18x4xbf16> to vector<16x16x4xbf16>
    %30 = vector.shape_cast %29 : vector<16x16x4xbf16> to vector<256x4xbf16>
    %31 = vector.extract_strided_slice %28 {offsets = [0, 1, 0], sizes = [16, 16, 4], strides = [1, 1, 1]} : vector<18x18x4xbf16> to vector<16x16x4xbf16>
    %32 = vector.shape_cast %31 : vector<16x16x4xbf16> to vector<256x4xbf16>
    %33 = vector.extract_strided_slice %28 {offsets = [0, 2, 0], sizes = [16, 16, 4], strides = [1, 1, 1]} : vector<18x18x4xbf16> to vector<16x16x4xbf16>
    %34 = vector.shape_cast %33 : vector<16x16x4xbf16> to vector<256x4xbf16>
    %35 = vector.extract_strided_slice %28 {offsets = [1, 0, 0], sizes = [16, 16, 4], strides = [1, 1, 1]} : vector<18x18x4xbf16> to vector<16x16x4xbf16>
    %36 = vector.shape_cast %35 : vector<16x16x4xbf16> to vector<256x4xbf16>
    %37 = vector.extract_strided_slice %28 {offsets = [1, 1, 0], sizes = [16, 16, 4], strides = [1, 1, 1]} : vector<18x18x4xbf16> to vector<16x16x4xbf16>
    %38 = vector.shape_cast %37 : vector<16x16x4xbf16> to vector<256x4xbf16>
    %39 = vector.extract_strided_slice %28 {offsets = [1, 2, 0], sizes = [16, 16, 4], strides = [1, 1, 1]} : vector<18x18x4xbf16> to vector<16x16x4xbf16>
    %40 = vector.shape_cast %39 : vector<16x16x4xbf16> to vector<256x4xbf16>
    %41 = vector.extract_strided_slice %28 {offsets = [2, 0, 0], sizes = [16, 16, 4], strides = [1, 1, 1]} : vector<18x18x4xbf16> to vector<16x16x4xbf16>
    %42 = vector.shape_cast %41 : vector<16x16x4xbf16> to vector<256x4xbf16>
    %43 = vector.extract_strided_slice %28 {offsets = [2, 1, 0], sizes = [16, 16, 4], strides = [1, 1, 1]} : vector<18x18x4xbf16> to vector<16x16x4xbf16>
    %44 = vector.shape_cast %43 : vector<16x16x4xbf16> to vector<256x4xbf16>
    %45 = vector.extract_strided_slice %28 {offsets = [2, 2, 0], sizes = [16, 16, 4], strides = [1, 1, 1]} : vector<18x18x4xbf16> to vector<16x16x4xbf16>
    %46 = vector.shape_cast %45 : vector<16x16x4xbf16> to vector<256x4xbf16>
    %47 = tpu.concatenate %30, %32, %34, %36, %38, %40, %42, %44, %46 in 1 : vector<256x4xbf16>, vector<256x4xbf16>, vector<256x4xbf16>, vector<256x4xbf16>, vector<256x4xbf16>, vector<256x4xbf16>, vector<256x4xbf16>, vector<256x4xbf16>, vector<256x4xbf16> -> vector<256x36xbf16>
    %c0_14 = arith.constant 0 : index
    %c0_15 = arith.constant 0 : index
    %48 = vector.load %arg6[%c0_14, %c0_15] : memref<36x128xbf16, #tpu.memory_space<vmem>>, vector<36x128xbf16>
    %cst_16 = arith.constant dense<0.000000e+00> : vector<256x128xf32>
    %49 = tpu.matmul %47, %48, %cst_16 {dimension_numbers = #tpu.dot_dimension_numbers<[1], [0], [0], [1], [0, 0, 1, 1], [], []>} : vector<256x36xbf16>, vector<36x128xbf16>, vector<256x128xf32> -> vector<256x128xf32>
    %c0_17 = arith.constant 0 : index
    %c0_18 = arith.constant 0 : index
    %50 = vector.load %arg7[%c0_17, %c0_18] : memref<1x128xf32, #tpu.memory_space<vmem>>, vector<1x128xf32>
    %51 = vector.broadcast %50 : vector<1x128xf32> to vector<256x128xf32>
    %52 = arith.mulf %49, %51 : vector<256x128xf32>
    %c0_19 = arith.constant 0 : index
    %c0_20 = arith.constant 0 : index
    %53 = vector.load %arg8[%c0_19, %c0_20] : memref<1x128xf32, #tpu.memory_space<vmem>>, vector<1x128xf32>
    %54 = vector.broadcast %53 : vector<1x128xf32> to vector<256x128xf32>
    %55 = arith.addf %52, %54 : vector<256x128xf32>
    %56 = vector.shape_cast %55 : vector<256x128xf32> to vector<16x16x128xf32>
    %57 = vector.extract_strided_slice %2 {offsets = [0, 1, 0], sizes = [16, 16, 4], strides = [1, 1, 1]} : vector<16x18x4xf32> to vector<16x16x4xf32>
    %cst_21 = arith.constant 0.000000e+00 : f32
    %58 = vector.broadcast %cst_21 : f32 to vector<16x16x124xf32>
    %59 = tpu.concatenate %57, %58 in 2 : vector<16x16x4xf32>, vector<16x16x124xf32> -> vector<16x16x128xf32>
    %60 = arith.addf %56, %59 : vector<16x16x128xf32>
    %c0_22 = arith.constant 0 : index
    %c0_23 = arith.constant 0 : index
    %c0_24 = arith.constant 0 : index
    %c0_25 = arith.constant 0 : index
    %61 = vector.load %arg9[%c0_22, %c0_23, %c0_24, %c0_25] : memref<1x16x16x128xf32, #tpu.memory_space<vmem>>, vector<1x16x16x128xf32>
    %62 = vector.shape_cast %61 : vector<1x16x16x128xf32> to vector<16x16x128xf32>
    %63 = vector.shape_cast %60 : vector<16x16x128xf32> to vector<1x16x16x128xf32>
    tpu.vector_store %arg9[%c0_22, %c0_23, %c0_24, %c0_25], %63 {strides = array<i32>} : memref<1x16x16x128xf32, #tpu.memory_space<vmem>>, vector<1x16x16x128xf32>,
    return
  }
  func.func @transform_0(%arg0: i32, %arg1: i32) -> i32 {
    %c0_i32 = arith.constant 0 : i32
    %c0_i32_0 = arith.constant 0 : i32
    return %c0_i32 : i32
  }
  func.func @transform_1(%arg0: i32, %arg1: i32) -> (i32, i32, i32, i32) {
    %c0_i32 = arith.constant 0 : i32
    %c0_i32_0 = arith.constant 0 : i32
    %c0_i32_1 = arith.constant 0 : i32
    return %arg0, %arg1, %c0_i32, %c0_i32_0 : i32, i32, i32, i32
  }
  func.func @transform_2(%arg0: i32, %arg1: i32) -> (i32, i32, i32, i32) {
    %c16_i32 = arith.constant 16 : i32
    %0 = arith.muli %arg1, %c16_i32 : i32
    %c1_i32 = arith.constant 1 : i32
    %1 = arith.subi %0, %c1_i32 : i32
    %c0_i32 = arith.constant 0 : i32
    %2 = arith.maxsi %1, %c0_i32 : i32
    %c0_i32_0 = arith.constant 0 : i32
    %c0_i32_1 = arith.constant 0 : i32
    %c0_i32_2 = arith.constant 0 : i32
    return %arg0, %2, %c0_i32_0, %c0_i32_1 : i32, i32, i32, i32
  }
  func.func @transform_3(%arg0: i32, %arg1: i32) -> (i32, i32, i32, i32) {
    %c16_i32 = arith.constant 16 : i32
    %0 = arith.muli %arg1, %c16_i32 : i32
    %c16_i32_0 = arith.constant 16 : i32
    %1 = arith.addi %0, %c16_i32_0 : i32
    %c15_i32 = arith.constant 15 : i32
    %2 = arith.minsi %1, %c15_i32 : i32
    %c0_i32 = arith.constant 0 : i32
    %c0_i32_1 = arith.constant 0 : i32
    %c0_i32_2 = arith.constant 0 : i32
    return %arg0, %2, %c0_i32, %c0_i32_1 : i32, i32, i32, i32
  }
  func.func @transform_4(%arg0: i32, %arg1: i32) -> (i32, i32) {
    %c0_i32 = arith.constant 0 : i32
    %c0_i32_0 = arith.constant 0 : i32
    %c0_i32_1 = arith.constant 0 : i32
    return %c0_i32, %c0_i32_0 : i32, i32
  }
  func.func @transform_5(%arg0: i32, %arg1: i32) -> (i32, i32) {
    %c0_i32 = arith.constant 0 : i32
    %c0_i32_0 = arith.constant 0 : i32
    %c0_i32_1 = arith.constant 0 : i32
    return %c0_i32, %c0_i32_0 : i32, i32
  }
  func.func @transform_6(%arg0: i32, %arg1: i32) -> (i32, i32) {
    %c0_i32 = arith.constant 0 : i32
    %c0_i32_0 = arith.constant 0 : i32
    %c0_i32_1 = arith.constant 0 : i32
    return %c0_i32, %c0_i32_0 : i32, i32
  }
  func.func @transform_7(%arg0: i32, %arg1: i32) -> (i32, i32, i32, i32) {
    %c0_i32 = arith.constant 0 : i32
    %c0_i32_0 = arith.constant 0 : i32
    %c0_i32_1 = arith.constant 0 : i32
    return %arg0, %arg1, %c0_i32, %c0_i32_0 : i32, i32, i32, i32
  }
}

</mosaic_0001>

<bundles_post_ra>
// kernel: basic_block_forward.1
= control target key start
LH: loop header
LB: loop body
LE: loop exit
PB: predicated region body
PF: predicated region fallthrough
CT: control target
= control target key end

     0   :  { %12 = vsyncpa [#allocation3], 0  ;;  %s3015_s24 = smov 0   ;;  %s3017_s25 = smov 0   ;;  %s4511_s0 = inlined_call_operand.vmem [shape: f32[2], index: 0, kind: input, shape index: {}]   ;;  %s4512_s1 = inlined_call_operand.vmem [shape: f32[2,16,18,4], index: 1, kind: input, shape index: {}, may-alias: {1,2,3}]   ;;  %s4513_s2 = inlined_call_operand.vmem [shape: f32[2,16,18,4], index: 2, kind: input, shape index: {}, may-alias: {1,2,3}]   ;;  %s4514_s3 = inlined_call_operand.vmem [shape: f32[2,16,18,4], index: 3, kind: input, shape index: {}, may-alias: {1,2,3}]   ;;  %s4515_s4 = inlined_call_operand.vmem [shape: bf16[36,128], index: 4, kind: input, shape index: {}]   ;;  %s4516_s5 = inlined_call_operand.vmem [shape: f32[1,128], index: 5, kind: input, shape index: {}]   ;;  %s4517_s6 = inlined_call_operand.vmem [shape: f32[1,128], index: 6, kind: input, shape index: {}]   ;;  %s4518_s7 = inlined_call_operand.vmem [shape: f32[2,16,16,128], index: 7, kind: output, shape index: {}]  }
   0x1   :  { %s3019_s2 = smov 0  }
   0x2 LB: > { %s2701_s3 = sadd.s32 4294967295, %s2962_s2   ;;  %s30_s26 = sadd.s32 1, %s2958_s25  ;;  %s2962_s2 = sphi %s3019_s2, %s18_s2   ;;  %s2958_s25 = sphi %s3017_s25, %s4619_s25   ;;  %s2954_s24 = sphi %s3015_s24, %s4618_s24  }
   0x3   : > { %p32_p0 = scmp.ge.s32.totalorder %s30_s26, 2  ;;  %p2703_p1 = scmp.ge.s32.totalorder %s2962_s2, 1 }
   0x4   : > { %p247_p2 = scmp.lt.s32.totalorder %s2962_s2, 3  ;;  %p2834_p4 = scmp.eq.s32.totalorder %s2701_s3, 0 }
   0x5   : > { %s4621_s26 = smov (%p32_p0, %s30_s26), 0  ;;  %s259_s29 = sshll.u32 %s4511_s0, 4  ;;  %s260_s29 = int_to_ptr.vmem [resolvable:$true] %s259_s29 }
   0x6   : > { %p248_p3 = pnand %p2703_p1, %p247_p2  ;;  %s2964_s30 = smov [#allocation2]  }
   0x8   : > { %p2830_p5 = pneg %p248_p3  ;;  %335 = sbr.rel (%p248_p3) target bundleno = 692 (0x2b4), region = 48 }
   0xa   : > { %p2831_p6 = pnand %p2834_p4, %p2830_p5 }
   0xc   : > { %2833 = dma.vmem_to_smem (!%p2831_p6), %s260_s29, 16, %s2964_s30, [#allocation3]  }
   0xd   : > { %2949 = dma.done.wait (%p2834_p4), [#allocation3], 16  }
   0xe   : > { %2951 = vsyncadd (%p2834_p4), [#allocation3], 4294967280 }
   0xf   : > { %342 = sfence }
  0x10   : > { %vm744_vm0 = vsmask.f32 3328  ;;  %vm745_vm1 = vsmask.f32 7440  ;;  %v4519_v0 = vmov 0   ;;  %p406_p7 = scmp.lt.s32.totalorder %s2954_s24, 1 }
  0x11   : > { %v750_v1 = vrot.slane %v4519_v0, 4  ;;  %v3039_v2 = vrot.slane %v4519_v0, 5  ;;  %s462_s8 = sld [smem:[#allocation2]]  ;;  %vm3044_vm2 = vmor %vm744_vm0, %vm745_vm1  ;;  %v4564_v4 = vmov 0  ;;  %v4524_v16 = vmov 0.0   ;;  %s2967_s13 = smov 4  }
  0x12   : > { %s4623_s24 = smov (!%p406_p7, %s2954_s24), 1  ;;  %v4565_v4 = vsel %vm3044_vm2, 4294967295, %v4564_v4  ;;  %s2968_s14 = smov 8  }
  0x13   : > { %v754_v3 = vor.u32 %v3039_v2, %v750_v1  ;;  %4566 = vst [vmem:[#allocation5_spill] sm:$0xff] %v4565_v4  ;;  %s2825_s9 = smul.u32 384, %s4623_s24  ;;  %s2969_s15 = smov 12  }
  0x14   : > { %s2970_s16 = smov 16   ;;  %s2971_s17 = smov 20  }
  0x15   : > { %v755_v5 = vrot.slane %v754_v3, 4  ;;  %s3055_s12 = scalar_lea.vmem %s4512_s1, %s2825_s9  ;;  %s2972_s18 = smov 24  }
  0x16   : > { %v472_v9 = vld [vmem:[%s3055_s12 + $0x48] sm:$0xff]  ;;  %v473_v10 = vld [vmem:[%s3055_s12 + $0x50] sm:$0xff]  ;;  %v474_v11 = vld [vmem:[%s3055_s12 + $0x58] sm:$0x3]  ;;  %s2973_s19 = smov 28   ;;  %s2974_s20 = smov 32  }
  0x17   : > { %v760_v6 = vsel %vm3044_vm2, %v755_v5, %v3039_v2  ;;  %v3057_v7 = vstv %s462_s8  ;;  %v466_v12 = vld [vmem:[%s3055_s12 + $0x18] sm:$0xff]  ;;  %v467_v13 = vld [vmem:[%s3055_s12 + $0x20] sm:$0xff]  ;;  %v468_v14 = vld [vmem:[%s3055_s12 + $0x28] sm:$0x3]  ;;  %s2813_s10 = sshll.u32 %s4623_s24, 8 }
  0x18   : > { %v1410_v8 = vunpack.c.l.b16 %v760_v6  ;;  %vm527_vm3 = vcmp.gt.f32.partialorder %v472_v9, %v3057_v7  ;;  %vm528_vm4 = vcmp.gt.f32.partialorder %v473_v10, %v3057_v7  ;;  %vm529_vm5 = vcmp.gt.f32.partialorder %v474_v11, %v3057_v7  ;;  %v463_v20 = vld [vmem:[%s3055_s12] sm:$0xff]  ;;  %v464_v33 = vld [vmem:[%s3055_s12 + $0x8] sm:$0xff]  ;;  %v465_v42 = vld [vmem:[%s3055_s12 + $0x10] sm:$0x3] }
  0x19   : > { %v2722_v17 = vsel %vm527_vm3, 1.0, %v4524_v16  ;;  %v2723_v18 = vsel %vm528_vm4, 1.0, %v4524_v16  ;;  %v2724_v19 = vsel %vm529_vm5, 1.0, %v4524_v16  ;;  %vm521_vm6 = vcmp.gt.f32.partialorder %v466_v12, %v3057_v7  ;;  %v475_v61 = vld [vmem:[%s3055_s12 + $0x60] sm:$0xff]  ;;  %v476_v62 = vld [vmem:[%s3055_s12 + $0x68] sm:$0xff] }
  0x1a   : > { %v3068_v15 = vpack.c.b16 %v1410_v8, %v1410_v8  ;;  %v3074_v21 = vpack.c.bf16 %v2722_v17, %v2722_v17  ;;  %v3076_v22 = vpack.c.bf16 %v2723_v18, %v2723_v18  ;;  %v3078_v23 = vpack.c.bf16 %v2724_v19, %v2724_v19  ;;  %v477_v19 = vld [vmem:[%s3055_s12 + $0x70] sm:$0x3] }
  0x1b   : > { %vm522_vm7 = vcmp.gt.f32.partialorder %v467_v13, %v3057_v7  ;;  %vm523_vm8 = vcmp.gt.f32.partialorder %v468_v14, %v3057_v7  ;;  %v2716_v24 = vsel %vm521_vm6, 1.0, %v4524_v16  ;;  %vm518_vm9 = vcmp.gt.f32.partialorder %v463_v20, %v3057_v7 }
  0x1c   : > { %4567 = vst [vmem:[#allocation6_spill] sm:$0xff] %v3068_v15  ;;  %1458 = vrot.lane.b32.xlu0 %v3068_v15, %s2967_s13  ;;  %v844_v25 = vshrl.u32 %v3074_v21, 16  ;;  %v847_v26 = vshll.u32 %v3074_v21, 16  ;;  %v853_v27 = vshll.u32 %v3076_v22, 16  ;;  %v857_v28 = vshrl.u32 %v3076_v22, 16  ;;  %v496_v15 = vld [vmem:[%s3055_s12 + $0x108] sm:$0xff] }
  0x1d   : > { %v863_v29 = vshll.u32 %v3078_v23, 16  ;;  %v2717_v30 = vsel %vm522_vm7, 1.0, %v4524_v16  ;;  %v2718_v31 = vsel %vm523_vm8, 1.0, %v4524_v16  ;;  %v3094_v32 = vpack.c.bf16 %v2716_v24, %v2716_v24 }
  0x1e   : > { %v846_v34 = vrot.slane %v844_v25, 4  ;;  %v849_v35 = vrot.slane %v847_v26, 5  ;;  %v855_v36 = vrot.slane %v853_v27, 5  ;;  %v859_v37 = vrot.slane %v857_v28, 4 }
  0x1f   : > { %v865_v38 = vrot.slane %v863_v29, 5  ;;  %v3097_v39 = vpack.c.bf16 %v2717_v30, %v2717_v30  ;;  %v3099_v40 = vpack.c.bf16 %v2718_v31, %v2718_v31  ;;  %v796_v41 = vshrl.u32 %v3094_v32, 16  ;;  %v469_v31 = vld [vmem:[%s3055_s12 + $0x30] sm:$0xff] }
  0x20   : > { %v850_v43 = vor.u32 %v849_v35, %v846_v34  ;;  %v860_v44 = vor.u32 %v859_v37, %v855_v36  ;;  %v799_v45 = vshll.u32 %v3094_v32, 16  ;;  %vm519_vm10 = vcmp.gt.f32.partialorder %v464_v33, %v3057_v7  ;;  %v471_v37 = vld [vmem:[%s3055_s12 + $0x40] sm:$0x3] }
  0x21   : > { %v798_v46 = vrot.slane %v796_v41, 4  ;;  %v805_v47 = vshll.u32 %v3097_v39, 16  ;;  %v809_v48 = vshrl.u32 %v3097_v39, 16  ;;  %v815_v49 = vshll.u32 %v3099_v40, 16 }
  0x22   : > { %v851_v50 = vrot.slane %v850_v43, 4  ;;  %v861_v51 = vrot.slane %v860_v44, 4  ;;  %v801_v52 = vrot.slane %v799_v45, 5  ;;  %vm520_vm11 = vcmp.gt.f32.partialorder %v465_v42, %v3057_v7 }
  0x23   : > { %v807_v53 = vrot.slane %v805_v47, 5  ;;  %v811_v54 = vrot.slane %v809_v48, 4  ;;  %v817_v55 = vrot.slane %v815_v49, 5  ;;  %v2713_v56 = vsel %vm518_vm9, 1.0, %v4524_v16 }
  0x24   : > { %v856_v57 = vsel %vm3044_vm2, %v851_v50, %v855_v36  ;;  %v866_v58 = vsel %vm3044_vm2, %v861_v51, %v865_v38  ;;  %v802_v59 = vor.u32 %v801_v52, %v798_v46  ;;  %v2714_v60 = vsel %vm519_vm10, 1.0, %v4524_v16  ;;  %v470_v36 = vld [vmem:[%s3055_s12 + $0x38] sm:$0xff] }
  0x25   : > { %v1418_v63 = vunpack.c.l.b16 %v856_v57  ;;  %v1419_v1 = vunpack.c.l.b16 %v866_v58  ;;  %v812_v3 = vor.u32 %v811_v54, %v807_v53  ;;  %v2715_v5 = vsel %vm520_vm11, 1.0, %v4524_v16 }
  0x26   : > { %v803_v6 = vrot.slane %v802_v59, 4  ;;  %v3122_v8 = vpack.c.bf16 %v2713_v56, %v2713_v56  ;;  %v3124_v9 = vpack.c.bf16 %v2714_v60, %v2714_v60  ;;  %v3126_v10 = vpack.c.bf16 %v2715_v5, %v2715_v5 }
  0x27   : > { %v3128_v11 = vpack.c.b16 %v1419_v1, %v1418_v63  ;;  %v813_v12 = vrot.slane %v812_v3, 4  ;;  %vm530_vm12 = vcmp.gt.f32.partialorder %v475_v61, %v3057_v7  ;;  %vm531_vm13 = vcmp.gt.f32.partialorder %v476_v62, %v3057_v7  ;;  %v478_v3 = vld [vmem:[%s3055_s12 + $0x78] sm:$0xff] }
  0x28   : > { %v808_v13 = vsel %vm3044_vm2, %v803_v6, %v807_v53  ;;  %v772_v14 = vshrl.u32 %v3122_v8, 16  ;;  %v775_v17 = vshll.u32 %v3122_v8, 16  ;;  %v781_v18 = vshll.u32 %v3124_v9, 16 }
  0x29   : > { %4568 = vst [vmem:[#allocation7_spill] sm:$0xff] %v3128_v11  ;;  %1466 = vrot.lane.b32.xlu2 %v3128_v11, %s2967_s13  ;;  %v818_v20 = vsel %vm3044_vm2, %v813_v12, %v817_v55  ;;  %v1414_v24 = vunpack.c.l.b16 %v808_v13  ;;  %v785_v25 = vshrl.u32 %v3124_v9, 16  ;;  %v791_v26 = vshll.u32 %v3126_v10, 16 }
  0x2a   : > { %v1415_v27 = vunpack.c.l.b16 %v818_v20  ;;  %v774_v28 = vrot.slane %v772_v14, 4  ;;  %v777_v29 = vrot.slane %v775_v17, 5  ;;  %v783_v30 = vrot.slane %v781_v18, 5  ;;  %v479_v20 = vld [vmem:[%s3055_s12 + $0x80] sm:$0xff] }
  0x2b   : > { %v787_v33 = vrot.slane %v785_v25, 4  ;;  %v793_v34 = vrot.slane %v791_v26, 5  ;;  %vm532_vm14 = vcmp.gt.f32.partialorder %v477_v19, %v3057_v7  ;;  %v2725_v35 = vsel %vm530_vm12, 1.0, %v4524_v16 }
  0x2c   : > { %v3151_v38 = vpack.c.b16 %v1415_v27, %v1414_v24  ;;  %v778_v41 = vor.u32 %v777_v29, %v774_v28  ;;  %v2726_v42 = vsel %vm531_vm13, 1.0, %v4524_v16  ;;  %v2727_v43 = vsel %vm532_vm14, 1.0, %v4524_v16 }
  0x2d   : > { %v788_v44 = vor.u32 %v787_v33, %v783_v30  ;;  %v3157_v45 = vpack.c.bf16 %v2725_v35, %v2725_v35  ;;  %v3159_v46 = vpack.c.bf16 %v2726_v42, %v2726_v42  ;;  %v3161_v47 = vpack.c.bf16 %v2727_v43, %v2727_v43 }
  0x2e   : > { %4569 = vst [vmem:[#allocation8_spill] sm:$0xff] %v3151_v38  ;;  %1462 = vrot.lane.b32.xlu1 %v3151_v38, %s2967_s13  ;;  %v779_v48 = vrot.slane %v778_v41, 4  ;;  %vm524_vm15 = vcmp.gt.f32.partialorder %v469_v31, %v3057_v7  ;;  %vm525_vm0 = vcmp.gt.f32.partialorder %v470_v36, %v3057_v7  ;;  %vm526_vm1 = vcmp.gt.f32.partialorder %v471_v37, %v3057_v7  ;;  %v480_v31 = vld [vmem:[%s3055_s12 + $0x88] sm:$0x3] }
  0x2f   : > { %v789_v49 = vrot.slane %v788_v44, 4  ;;  %v868_v50 = vshrl.u32 %v3157_v45, 16  ;;  %v871_v51 = vshll.u32 %v3157_v45, 16  ;;  %v877_v52 = vshll.u32 %v3159_v46, 16 }
  0x30   : > { %v784_v53 = vsel %vm3044_vm2, %v779_v48, %v783_v30  ;;  %v881_v54 = vshrl.u32 %v3159_v46, 16  ;;  %v887_v55 = vshll.u32 %v3161_v47, 16  ;;  %v2719_v56 = vsel %vm524_vm15, 1.0, %v4524_v16 }
  0x31   : > { %v794_v57 = vsel %vm3044_vm2, %v789_v49, %v793_v34  ;;  %v1412_v58 = vunpack.c.l.b16 %v784_v53  ;;  %v870_v59 = vrot.slane %v868_v50, 4  ;;  %v873_v60 = vrot.slane %v871_v51, 5  ;;  %v484_v49 = vld [vmem:[%s3055_s12 + $0xa8] sm:$0xff]  ;;  %v485_v50 = vld [vmem:[%s3055_s12 + $0xb0] sm:$0xff] }
  0x32   : > { %v1413_v61 = vunpack.c.l.b16 %v794_v57  ;;  %v879_v62 = vrot.slane %v877_v52, 5  ;;  %v883_v63 = vrot.slane %v881_v54, 4  ;;  %v889_v1 = vrot.slane %v887_v55, 5 }
  0x33   : > { %v874_v5 = vor.u32 %v873_v60, %v870_v59  ;;  %v2720_v6 = vsel %vm525_vm0, 1.0, %v4524_v16  ;;  %v2721_v12 = vsel %vm526_vm1, 1.0, %v4524_v16  ;;  %v3185_v13 = vpack.c.bf16 %v2719_v56, %v2719_v56 }
  0x34   : > { %v3187_v14 = vpack.c.b16 %v1413_v61, %v1412_v58  ;;  %v884_v17 = vor.u32 %v883_v63, %v879_v62  ;;  %v3189_v18 = vpack.c.bf16 %v2720_v6, %v2720_v6  ;;  %v3191_v19 = vpack.c.bf16 %v2721_v12, %v2721_v12 }
  0x35   : > { %v875_v24 = vrot.slane %v874_v5, 4  ;;  %v820_v25 = vshrl.u32 %v3185_v13, 16  ;;  %v823_v26 = vshll.u32 %v3185_v13, 16  ;;  %vm533_vm3 = vcmp.gt.f32.partialorder %v478_v3, %v3057_v7  ;;  %v486_v3 = vld [vmem:[%s3055_s12 + $0xb8] sm:$0x3] }
  0x36   : > { %4570 = vst [vmem:[#allocation9_spill] sm:$0xff] %v3187_v14  ;;  %1460 = vrot.lane.b32.xlu0 %v3187_v14, %s2967_s13  ;;  %v885_v27 = vrot.slane %v884_v17, 4  ;;  %v829_v28 = vshll.u32 %v3189_v18, 16  ;;  %v833_v29 = vshrl.u32 %v3189_v18, 16  ;;  %v839_v30 = vshll.u32 %v3191_v19, 16 }
  0x37   : > { %v880_v33 = vsel %vm3044_vm2, %v875_v24, %v879_v62  ;;  %v822_v34 = vrot.slane %v820_v25, 4  ;;  %v825_v35 = vrot.slane %v823_v26, 5  ;;  %vm534_vm4 = vcmp.gt.f32.partialorder %v479_v20, %v3057_v7 }
  0x38   : > { %v890_v36 = vsel %vm3044_vm2, %v885_v27, %v889_v1  ;;  %v1420_v37 = vunpack.c.l.b16 %v880_v33  ;;  %v831_v41 = vrot.slane %v829_v28, 5  ;;  %v835_v42 = vrot.slane %v833_v29, 4  ;;  %v481_v27 = vld [vmem:[%s3055_s12 + $0x90] sm:$0xff]  ;;  %v483_v33 = vld [vmem:[%s3055_s12 + $0xa0] sm:$0x3] }
  0x39   : > { %v1421_v43 = vunpack.c.l.b16 %v890_v36  ;;  %v826_v44 = vor.u32 %v825_v35, %v822_v34  ;;  %v841_v48 = vrot.slane %v839_v30, 5  ;;  %vm535_vm5 = vcmp.gt.f32.partialorder %v480_v31, %v3057_v7  ;;  %v482_v31 = vld [vmem:[%s3055_s12 + $0x98] sm:$0xff] }
  0x3a   : > { %v836_v51 = vor.u32 %v835_v42, %v831_v41  ;;  %v2728_v52 = vsel %vm533_vm3, 1.0, %v4524_v16  ;;  %v2729_v53 = vsel %vm534_vm4, 1.0, %v4524_v16  ;;  %v2730_v54 = vsel %vm535_vm5, 1.0, %v4524_v16 }
  0x3b   : > { %v3216_v55 = vpack.c.b16 %v1421_v43, %v1420_v37  ;;  %v827_v56 = vrot.slane %v826_v44, 4  ;;  %v3218_v57 = vpack.c.bf16 %v2728_v52, %v2728_v52  ;;  %v3220_v58 = vpack.c.bf16 %v2729_v53, %v2729_v53 }
  0x3c   : > { %v837_v59 = vrot.slane %v836_v51, 4  ;;  %v3222_v60 = vpack.c.bf16 %v2730_v54, %v2730_v54  ;;  %vm539_vm6 = vcmp.gt.f32.partialorder %v484_v49, %v3057_v7  ;;  %vm540_vm7 = vcmp.gt.f32.partialorder %v485_v50, %v3057_v7 }
  0x3d   : > { %4571 = vst [vmem:[#allocation10_spill] sm:$0xff] %v3216_v55  ;;  %1468 = vrot.lane.b32.xlu2 %v3216_v55, %s2967_s13  ;;  %v832_v61 = vsel %vm3044_vm2, %v827_v56, %v831_v41  ;;  %v892_v62 = vshrl.u32 %v3218_v57, 16  ;;  %v895_v63 = vshll.u32 %v3218_v57, 16  ;;  %v901_v1 = vshll.u32 %v3220_v58, 16 }
  0x3e   : > { %v842_v5 = vsel %vm3044_vm2, %v837_v59, %v841_v48  ;;  %v1416_v6 = vunpack.c.l.b16 %v832_v61  ;;  %v905_v12 = vshrl.u32 %v3220_v58, 16  ;;  %v911_v17 = vshll.u32 %v3222_v60, 16 }
  0x3f   : > { %v1417_v20 = vunpack.c.l.b16 %v842_v5  ;;  %v894_v24 = vrot.slane %v892_v62, 4  ;;  %v897_v25 = vrot.slane %v895_v63, 5  ;;  %v903_v26 = vrot.slane %v901_v1, 5 }
  0x40   : > { %v907_v28 = vrot.slane %v905_v12, 4  ;;  %v913_v29 = vrot.slane %v911_v17, 5  ;;  %vm541_vm8 = vcmp.gt.f32.partialorder %v486_v3, %v3057_v7  ;;  %v2734_v30 = vsel %vm539_vm6, 1.0, %v4524_v16  ;;  %v487_v17 = vld [vmem:[%s3055_s12 + $0xc0] sm:$0xff] }
  0x41   : > { %v3245_v34 = vpack.c.b16 %v1417_v20, %v1416_v6  ;;  %v898_v35 = vor.u32 %v897_v25, %v894_v24  ;;  %v2735_v36 = vsel %vm540_vm7, 1.0, %v4524_v16  ;;  %v2736_v37 = vsel %vm541_vm8, 1.0, %v4524_v16 }
  0x42   : > { %v908_v41 = vor.u32 %v907_v28, %v903_v26  ;;  %v3251_v42 = vpack.c.bf16 %v2734_v30, %v2734_v30  ;;  %v3253_v43 = vpack.c.bf16 %v2735_v36, %v2735_v36  ;;  %v3255_v44 = vpack.c.bf16 %v2736_v37, %v2736_v37 }
  0x43   : > { %4572 = vst [vmem:[#allocation11_spill] sm:$0xff] %v3245_v34  ;;  %1464 = vrot.lane.b32.xlu1 %v3245_v34, %s2967_s13  ;;  %v899_v48 = vrot.slane %v898_v35, 4  ;;  %vm536_vm9 = vcmp.gt.f32.partialorder %v481_v27, %v3057_v7  ;;  %vm537_vm10 = vcmp.gt.f32.partialorder %v482_v31, %v3057_v7  ;;  %vm538_vm11 = vcmp.gt.f32.partialorder %v483_v33, %v3057_v7  ;;  %v488_v35 = vld [vmem:[%s3055_s12 + $0xc8] sm:$0xff]  ;;  %v502_v34 = vld [vmem:[%s3055_s12 + $0x138] sm:$0xff] }
  0x44   : > { %v909_v49 = vrot.slane %v908_v41, 4  ;;  %v940_v50 = vshrl.u32 %v3251_v42, 16  ;;  %v943_v51 = vshll.u32 %v3251_v42, 16  ;;  %v949_v52 = vshll.u32 %v3253_v43, 16 }
  0x45   : > { %v904_v53 = vsel %vm3044_vm2, %v899_v48, %v903_v26  ;;  %v953_v54 = vshrl.u32 %v3253_v43, 16  ;;  %v959_v56 = vshll.u32 %v3255_v44, 16  ;;  %v2731_v59 = vsel %vm536_vm9, 1.0, %v4524_v16 }
  0x46   : > { %v914_v61 = vsel %vm3044_vm2, %v909_v49, %v913_v29  ;;  %v1422_v62 = vunpack.c.l.b16 %v904_v53  ;;  %v942_v63 = vrot.slane %v940_v50, 4  ;;  %v945_v1 = vrot.slane %v943_v51, 5  ;;  %v489_v50 = vld [vmem:[%s3055_s12 + $0xd0] sm:$0x3] }
  0x47   : > { %v1423_v3 = vunpack.c.l.b16 %v914_v61  ;;  %v951_v5 = vrot.slane %v949_v52, 5  ;;  %v955_v6 = vrot.slane %v953_v54, 4  ;;  %v961_v12 = vrot.slane %v959_v56, 5 }
  0x48   : > { %v946_v20 = vor.u32 %v945_v1, %v942_v63  ;;  %v2732_v24 = vsel %vm537_vm10, 1.0, %v4524_v16  ;;  %v2733_v25 = vsel %vm538_vm11, 1.0, %v4524_v16  ;;  %v3279_v26 = vpack.c.bf16 %v2731_v59, %v2731_v59 }
  0x49   : > { %v3281_v27 = vpack.c.b16 %v1423_v3, %v1422_v62  ;;  %v956_v28 = vor.u32 %v955_v6, %v951_v5  ;;  %v3283_v29 = vpack.c.bf16 %v2732_v24, %v2732_v24  ;;  %v3285_v30 = vpack.c.bf16 %v2733_v25, %v2733_v25  ;;  %v493_v3 = vld [vmem:[%s3055_s12 + $0xf0] sm:$0xff]  ;;  %v494_v6 = vld [vmem:[%s3055_s12 + $0xf8] sm:$0xff] }
  0x4a   : > { %v947_v36 = vrot.slane %v946_v20, 4  ;;  %v916_v37 = vshrl.u32 %v3279_v26, 16  ;;  %v919_v31 = vshll.u32 %v3279_v26, 16  ;;  %vm542_vm12 = vcmp.gt.f32.partialorder %v487_v17, %v3057_v7 }
  0x4b   : > { %4573 = vst [vmem:[#allocation12_spill] sm:$0xff] %v3281_v27  ;;  %1470 = vrot.lane.b32.xlu0 %v3281_v27, %s2967_s13  ;;  %v957_v33 = vrot.slane %v956_v28, 4  ;;  %v925_v41 = vshll.u32 %v3283_v29, 16  ;;  %v929_v48 = vshrl.u32 %v3283_v29, 16  ;;  %v935_v49 = vshll.u32 %v3285_v30, 16  ;;  %v503_v27 = vld [vmem:[%s3055_s12 + $0x140] sm:$0xff] }
  0x4c   : > { %v952_v51 = vsel %vm3044_vm2, %v947_v36, %v951_v5  ;;  %v918_v52 = vrot.slane %v916_v37, 4  ;;  %v921_v53 = vrot.slane %v919_v31, 5  ;;  %vm543_vm13 = vcmp.gt.f32.partialorder %v488_v35, %v3057_v7 }
  0x4d   : > { %v962_v54 = vsel %vm3044_vm2, %v957_v33, %v961_v12  ;;  %v1426_v56 = vunpack.c.l.b16 %v952_v51  ;;  %v927_v59 = vrot.slane %v925_v41, 5  ;;  %v931_v61 = vrot.slane %v929_v48, 4 }
  0x4e   : > { %v1427_v62 = vunpack.c.l.b16 %v962_v54  ;;  %v922_v63 = vor.u32 %v921_v53, %v918_v52  ;;  %v937_v1 = vrot.slane %v935_v49, 5  ;;  %vm544_vm14 = vcmp.gt.f32.partialorder %v489_v50, %v3057_v7  ;;  %v495_v49 = vld [vmem:[%s3055_s12 + $0x100] sm:$0x3] }
  0x4f   : > { %v932_v20 = vor.u32 %v931_v61, %v927_v59  ;;  %v2737_v5 = vsel %vm542_vm12, 1.0, %v4524_v16  ;;  %v2738_v24 = vsel %vm543_vm13, 1.0, %v4524_v16  ;;  %v2739_v12 = vsel %vm544_vm14, 1.0, %v4524_v16 }
  0x50   : > { %v3310_v25 = vpack.c.b16 %v1427_v62, %v1426_v56  ;;  %v923_v28 = vrot.slane %v922_v63, 4  ;;  %v3312_v35 = vpack.c.bf16 %v2737_v5, %v2737_v5  ;;  %v3314_v36 = vpack.c.bf16 %v2738_v24, %v2738_v24  ;;  %v490_v62 = vld [vmem:[%s3055_s12 + $0xd8] sm:$0xff]  ;;  %v491_v24 = vld [vmem:[%s3055_s12 + $0xe0] sm:$0xff] }
  0x51   : > { %v933_v37 = vrot.slane %v932_v20, 4  ;;  %v3316_v31 = vpack.c.bf16 %v2739_v12, %v2739_v12  ;;  %vm548_vm15 = vcmp.gt.f32.partialorder %v493_v3, %v3057_v7  ;;  %vm549_vm0 = vcmp.gt.f32.partialorder %v494_v6, %v3057_v7 }
  0x52   : > { %4574 = vst [vmem:[#allocation13_spill] sm:$0xff] %v3310_v25  ;;  %1474 = vrot.lane.b32.xlu2 %v3310_v25, %s2967_s13  ;;  %v928_v17 = vsel %vm3044_vm2, %v923_v28, %v927_v59  ;;  %v964_v33 = vshrl.u32 %v3312_v35, 16  ;;  %v967_v41 = vshll.u32 %v3312_v35, 16  ;;  %v973_v48 = vshll.u32 %v3314_v36, 16 }
  0x53   : > { %v938_v50 = vsel %vm3044_vm2, %v933_v37, %v937_v1  ;;  %v1424_v51 = vunpack.c.l.b16 %v928_v17  ;;  %v977_v52 = vshrl.u32 %v3314_v36, 16  ;;  %v983_v53 = vshll.u32 %v3316_v31, 16  ;;  %v492_v1 = vld [vmem:[%s3055_s12 + $0xe8] sm:$0x3] }
  0x54   : > { %v1425_v54 = vunpack.c.l.b16 %v938_v50  ;;  %v966_v56 = vrot.slane %v964_v33, 4  ;;  %v969_v59 = vrot.slane %v967_v41, 5  ;;  %v975_v61 = vrot.slane %v973_v48, 5 }
  0x55   : > { %v979_v63 = vrot.slane %v977_v52, 4  ;;  %v985_v20 = vrot.slane %v983_v53, 5  ;;  %vm550_vm1 = vcmp.gt.f32.partialorder %v495_v49, %v3057_v7  ;;  %v2743_v5 = vsel %vm548_vm15, 1.0, %v4524_v16 }
  0x56   : > { %v3339_v12 = vpack.c.b16 %v1425_v54, %v1424_v51  ;;  %v970_v28 = vor.u32 %v969_v59, %v966_v56  ;;  %v2744_v37 = vsel %vm549_vm0, 1.0, %v4524_v16  ;;  %v2745_v17 = vsel %vm550_vm1, 1.0, %v4524_v16 }
  0x57   : > { %v980_v33 = vor.u32 %v979_v63, %v975_v61  ;;  %v3345_v41 = vpack.c.bf16 %v2743_v5, %v2743_v5  ;;  %v3347_v48 = vpack.c.bf16 %v2744_v37, %v2744_v37  ;;  %v3349_v49 = vpack.c.bf16 %v2745_v17, %v2745_v17 }
  0x58   : > { %4575 = vst [vmem:[#allocation14_spill] sm:$0xff] %v3339_v12  ;;  %1472 = vrot.lane.b32.xlu1 %v3339_v12, %s2967_s13  ;;  %v971_v3 = vrot.slane %v970_v28, 4  ;;  %vm545_vm3 = vcmp.gt.f32.partialorder %v490_v62, %v3057_v7  ;;  %vm546_vm4 = vcmp.gt.f32.partialorder %v491_v24, %v3057_v7  ;;  %vm547_vm5 = vcmp.gt.f32.partialorder %v492_v1, %v3057_v7 }
  0x59   : > { %v981_v6 = vrot.slane %v980_v33, 4  ;;  %v1012_v50 = vshrl.u32 %v3345_v41, 16  ;;  %v1015_v51 = vshll.u32 %v3345_v41, 16  ;;  %v1021_v52 = vshll.u32 %v3347_v48, 16 }
  0x5a   : > { %v976_v53 = vsel %vm3044_vm2, %v971_v3, %v975_v61  ;;  %v1025_v54 = vshrl.u32 %v3347_v48, 16  ;;  %v1031_v56 = vshll.u32 %v3349_v49, 16  ;;  %v2740_v59 = vsel %vm545_vm3, 1.0, %v4524_v16 }
  0x5b   : > { %v986_v62 = vsel %vm3044_vm2, %v981_v6, %v985_v20  ;;  %v1428_v63 = vunpack.c.l.b16 %v976_v53  ;;  %v1014_v5 = vrot.slane %v1012_v50, 4  ;;  %v1017_v28 = vrot.slane %v1015_v51, 5  ;;  %v497_v53 = vld [vmem:[%s3055_s12 + $0x110] sm:$0xff] }
  0x5c   : > { %v1429_v37 = vunpack.c.l.b16 %v986_v62  ;;  %v1023_v17 = vrot.slane %v1021_v52, 5  ;;  %v1027_v33 = vrot.slane %v1025_v54, 4  ;;  %v1033_v0 = vrot.slane %v1031_v56, 5 }
  0x5d   : > { %v1018_v25 = vor.u32 %v1017_v28, %v1014_v5  ;;  %v2741_v61 = vsel %vm546_vm4, 1.0, %v4524_v16  ;;  %v2742_v3 = vsel %vm547_vm5, 1.0, %v4524_v16  ;;  %v3373_v20 = vpack.c.bf16 %v2740_v59, %v2740_v59  ;;  %v498_v5 = vld [vmem:[%s3055_s12 + $0x118] sm:$0x3] }
  0x5e   : > { %v3375_v6 = vpack.c.b16 %v1429_v37, %v1428_v63  ;;  %v1028_v50 = vor.u32 %v1027_v33, %v1023_v17  ;;  %v3377_v51 = vpack.c.bf16 %v2741_v61, %v2741_v61  ;;  %v3379_v52 = vpack.c.bf16 %v2742_v3, %v2742_v3 }
  0x5f   : > { %v1019_v54 = vrot.slane %v1018_v25, 4  ;;  %v988_v56 = vshrl.u32 %v3373_v20, 16  ;;  %v991_v24 = vshll.u32 %v3373_v20, 16  ;;  %vm551_vm6 = vcmp.gt.f32.partialorder %v496_v15, %v3057_v7 }
  0x60   : > { %4576 = vst [vmem:[#allocation15_spill] sm:$0xff] %v3375_v6  ;;  %1476 = vrot.lane.b32.xlu0 %v3375_v6, %s2967_s13  ;;  %v1029_v1 = vrot.slane %v1028_v50, 4  ;;  %v997_v59 = vshll.u32 %v3377_v51, 16  ;;  %v1001_v62 = vshrl.u32 %v3377_v51, 16  ;;  %v1007_v63 = vshll.u32 %v3379_v52, 16 }
  0x61   : > { %v1024_v25 = vsel %vm3044_vm2, %v1019_v54, %v1023_v17  ;;  %v990_v28 = vrot.slane %v988_v56, 4  ;;  %v993_v37 = vrot.slane %v991_v24, 5  ;;  %vm552_vm7 = vcmp.gt.f32.partialorder %v497_v53, %v3057_v7 }
  0x62   : > { %v1034_v33 = vsel %vm3044_vm2, %v1029_v1, %v1033_v0  ;;  %v1432_v61 = vunpack.c.l.b16 %v1024_v25  ;;  %v999_v3 = vrot.slane %v997_v59, 5  ;;  %v1003_v50 = vrot.slane %v1001_v62, 4 }
  0x63   : > { %v1433_v16 = vunpack.c.l.b16 %v1034_v33  ;;  %v994_v11 = vor.u32 %v993_v37, %v990_v28  ;;  %v1009_v12 = vrot.slane %v1007_v63, 5  ;;  %vm553_vm8 = vcmp.gt.f32.partialorder %v498_v5, %v3057_v7  ;;  %v504_v63 = vld [vmem:[%s3055_s12 + $0x148] sm:$0x3] }
  0x64   : > { %v1004_v38 = vor.u32 %v1003_v50, %v999_v3  ;;  %v4577_v55 = vmov 0.0   ;;  %vm557_vm9 = vcmp.gt.f32.partialorder %v502_v34, %v3057_v7  ;;  %vm558_vm10 = vcmp.gt.f32.partialorder %v503_v27, %v3057_v7 }
  0x65   : > { %v2746_v17 = vsel %vm551_vm6, 1.0, %v4577_v55  ;;  %v2747_v53 = vsel %vm552_vm7, 1.0, %v4577_v55  ;;  %v2748_v0 = vsel %vm553_vm8, 1.0, %v4577_v55  ;;  %v3404_v54 = vpack.c.b16 %v1433_v16, %v1432_v61 }
  0x66   : > { %v995_v56 = vrot.slane %v994_v11, 4  ;;  %v3406_v24 = vpack.c.bf16 %v2746_v17, %v2746_v17  ;;  %v3408_v1 = vpack.c.bf16 %v2747_v53, %v2747_v53  ;;  %v1005_v59 = vrot.slane %v1004_v38, 4  ;;  %v499_v17 = vld [vmem:[%s3055_s12 + $0x120] sm:$0xff] }
  0x67   : > { %4578 = vst [vmem:[#allocation16_spill] sm:$0xff] %v3404_v54  ;;  %v3410_v62 = vpack.c.bf16 %v2748_v0, %v2748_v0  ;;  %1480 = vrot.lane.b32.xlu2 %v3404_v54, %s2967_s13  ;;  %vm559_vm11 = vcmp.gt.f32.partialorder %v504_v63, %v3057_v7  ;;  %v500_v54 = vld [vmem:[%s3055_s12 + $0x128] sm:$0xff]  ;;  %vm554_vm12 = vcmp.gt.f32.partialorder %v499_v17, %v3057_v7  ;;  %vm1179_vm3 = vcmask 1042432  }
  0x68   : > { %v1000_v15 = vsel %vm3044_vm2, %v995_v56, %v999_v3  ;;  %v1036_v16 = vshrl.u32 %v3406_v24, 16  ;;  %v1039_v11 = vshll.u32 %v3406_v24, 16  ;;  %v1045_v38 = vshll.u32 %v3408_v1, 16 }
  0x69   : > { %4579 = vst [vmem:[#allocation17_spill] sm:$0xff] %v3410_v62  ;;  %v1010_v5 = vsel %vm3044_vm2, %v1005_v59, %v1009_v12  ;;  %v1430_v25 = vunpack.c.l.b16 %v1000_v15  ;;  %v1049_v28 = vshrl.u32 %v3408_v1, 16  ;;  %v1055_v37 = vshll.u32 %v3410_v62, 16  ;;  %v501_v12 = vld [vmem:[%s3055_s12 + $0x130] sm:$0x3] }
  0x6a   : > { %v1431_v33 = vunpack.c.l.b16 %v1010_v5  ;;  %v1038_v61 = vrot.slane %v1036_v16, 4  ;;  %v1041_v3 = vrot.slane %v1039_v11, 5  ;;  %v1047_v50 = vrot.slane %v1045_v38, 5 }
  0x6b   : > { %v1051_v53 = vrot.slane %v1049_v28, 4  ;;  %v1057_v0 = vrot.slane %v1055_v37, 5  ;;  %v2752_v56 = vsel %vm557_vm9, 1.0, %v4577_v55  ;;  %v2753_v16 = vsel %vm558_vm10, 1.0, %v4577_v55 }
  0x6c   : > { %v3433_v59 = vpack.c.b16 %v1431_v33, %v1430_v25  ;;  %v1042_v15 = vor.u32 %v1041_v3, %v1038_v61  ;;  %v2754_v11 = vsel %vm559_vm11, 1.0, %v4577_v55  ;;  %v3439_v5 = vpack.c.bf16 %v2752_v56, %v2752_v56 }
  0x6d   : > { %v1052_v38 = vor.u32 %v1051_v53, %v1047_v50  ;;  %v3441_v28 = vpack.c.bf16 %v2753_v16, %v2753_v16  ;;  %v3443_v63 = vpack.c.bf16 %v2754_v11, %v2754_v11  ;;  %vm555_vm13 = vcmp.gt.f32.partialorder %v500_v54, %v3057_v7 }
  0x6e   : > { %4580 = vst [vmem:[#allocation18_spill] sm:$0xff] %v3433_v59  ;;  %1478 = vrot.lane.b32.xlu1 %v3433_v59, %s2967_s13  ;;  %v1043_v34 = vrot.slane %v1042_v15, 4  ;;  %vm556_vm14 = vcmp.gt.f32.partialorder %v501_v12, %v3057_v7  ;;  %v1084_v25 = vshrl.u32 %v3439_v5, 16  ;;  %v1087_v37 = vshll.u32 %v3439_v5, 16 }
  0x6f   : > { %4581 = vst [vmem:[#allocation19_spill] sm:$0xff] %v3439_v5  ;;  %v1053_v27 = vrot.slane %v1052_v38, 4  ;;  %v1093_v33 = vshll.u32 %v3441_v28, 16  ;;  %v1097_v3 = vshrl.u32 %v3441_v28, 16  ;;  %v1103_v53 = vshll.u32 %v3443_v63, 16  ;;  %v505_v5 = vld [vmem:[%s3055_s12 + $0x150] sm:$0xff] }
  0x70   : > { %4582 = vst [vmem:[#allocation20_spill] sm:$0xff] %v3441_v28  ;;  %v1048_v61 = vsel %vm3044_vm2, %v1043_v34, %v1047_v50  ;;  %v2749_v17 = vsel %vm554_vm12, 1.0, %v4577_v55  ;;  %v1086_v16 = vrot.slane %v1084_v25, 4  ;;  %v1089_v11 = vrot.slane %v1087_v37, 5 }
  0x71   : > { %4583 = vst [vmem:[#allocation21_spill] sm:$0xff] %v3443_v63  ;;  %v1058_v56 = vsel %vm3044_vm2, %v1053_v27, %v1057_v0  ;;  %v1434_v15 = vunpack.c.l.b16 %v1048_v61  ;;  %v1095_v59 = vrot.slane %v1093_v33, 5  ;;  %v1099_v6 = vrot.slane %v1097_v3, 4  ;;  %v506_v61 = vld [vmem:[%s3055_s12 + $0x158] sm:$0xff] }
  0x72   : > { %v1435_v38 = vunpack.c.l.b16 %v1058_v56  ;;  %v1105_v14 = vrot.slane %v1103_v53, 5  ;;  %v1090_v62 = vor.u32 %v1089_v11, %v1086_v16  ;;  %v2750_v50 = vsel %vm555_vm13, 1.0, %v4577_v55 }
  0x73   : > { %v2751_v34 = vsel %vm556_vm14, 1.0, %v4577_v55  ;;  %v3467_v0 = vpack.c.bf16 %v2749_v17, %v2749_v17  ;;  %v1100_v25 = vor.u32 %v1099_v6, %v1095_v59  ;;  %v3471_v37 = vpack.c.bf16 %v2750_v50, %v2750_v50 }
  0x74   : > { %v3469_v27 = vpack.c.b16 %v1435_v38, %v1434_v15  ;;  %v3473_v33 = vpack.c.bf16 %v2751_v34, %v2751_v34  ;;  %v1091_v3 = vrot.slane %v1090_v62, 4  ;;  %vm560_vm15 = vcmp.gt.f32.partialorder %v505_v5, %v3057_v7  ;;  %v507_v15 = vld [vmem:[%s3055_s12 + $0x160] sm:$0x3] }
  0x75   : > { %v1060_v53 = vshrl.u32 %v3467_v0, 16  ;;  %v1063_v54 = vshll.u32 %v3467_v0, 16  ;;  %v1101_v12 = vrot.slane %v1100_v25, 4  ;;  %v1069_v17 = vshll.u32 %v3471_v37, 16 }
  0x76   : > { %4584 = vst [vmem:[#allocation22_spill] sm:$0xff] %v3469_v27  ;;  %1482 = vrot.lane.b32.xlu0 %v3469_v27, %s2967_s13  ;;  %v1073_v6 = vshrl.u32 %v3471_v37, 16  ;;  %v1079_v56 = vshll.u32 %v3473_v33, 16  ;;  %v1096_v62 = vsel %vm3044_vm2, %v1091_v3, %v1095_v59  ;;  %vm561_vm0 = vcmp.gt.f32.partialorder %v506_v61, %v3057_v7 }
  0x77   : > { %4585 = vst [vmem:[#allocation23_spill] sm:$0xff] %v3473_v33  ;;  %v1062_v16 = vrot.slane %v1060_v53, 4  ;;  %v1065_v11 = vrot.slane %v1063_v54, 5  ;;  %v1106_v38 = vsel %vm3044_vm2, %v1101_v12, %v1105_v14  ;;  %v1438_v50 = vunpack.c.l.b16 %v1096_v62 }
  0x78   : > { %v1071_v34 = vrot.slane %v1069_v17, 5  ;;  %v1075_v25 = vrot.slane %v1073_v6, 4  ;;  %v1439_v27 = vunpack.c.l.b16 %v1106_v38  ;;  %v1081_v28 = vrot.slane %v1079_v56, 5 }
  0x79   : > { %v1066_v63 = vor.u32 %v1065_v11, %v1062_v16  ;;  %vm562_vm1 = vcmp.gt.f32.partialorder %v507_v15, %v3057_v7  ;;  %v2755_v59 = vsel %vm560_vm15, 1.0, %v4577_v55  ;;  %v2756_v3 = vsel %vm561_vm0, 1.0, %v4577_v55 }
  0x7a   : > { %v1076_v33 = vor.u32 %v1075_v25, %v1071_v34  ;;  %v2757_v61 = vsel %vm562_vm1, 1.0, %v4577_v55  ;;  %v3496_v53 = vpack.c.b16 %v1439_v27, %v1438_v50  ;;  %v3498_v54 = vpack.c.bf16 %v2755_v59, %v2755_v59 }
  0x7b   : > { %v1067_v14 = vrot.slane %v1066_v63, 4  ;;  %v3500_v12 = vpack.c.bf16 %v2756_v3, %v2756_v3  ;;  %v3502_v6 = vpack.c.bf16 %v2757_v61, %v2757_v61  ;;  %vm1180_vm4 = vcmask 1046532  }
  0x7c   : > { %4586 = vst [vmem:[#allocation24_spill] sm:$0xff] %v3496_v53  ;;  %v1077_v17 = vrot.slane %v1076_v33, 4  ;;  %1486 = vrot.lane.b32.xlu2 %v3496_v53, %s2967_s13  ;;  %v1108_v56 = vshrl.u32 %v3498_v54, 16  ;;  %v1111_v27 = vshll.u32 %v3498_v54, 16  ;;  %vm3516_vm5 = vmor %vm1179_vm3, %vm1180_vm4  ;;  %v4589_v61 = vmov 0  }
  0x7d   : > { %v1072_v5 = vsel %vm3044_vm2, %v1067_v14, %v1071_v34  ;;  %v1117_v63 = vshll.u32 %v3500_v12, 16  ;;  %v1121_v62 = vshrl.u32 %v3500_v12, 16  ;;  %v1127_v16 = vshll.u32 %v3502_v6, 16 }
  0x7e   : > { %v1082_v15 = vsel %vm3044_vm2, %v1077_v17, %v1081_v28  ;;  %v1436_v33 = vunpack.c.l.b16 %v1072_v5  ;;  %v1110_v38 = vrot.slane %v1108_v56, 4  ;;  %v1113_v50 = vrot.slane %v1111_v27, 5 }
  0x7f   : > { %v1437_v11 = vunpack.c.l.b16 %v1082_v15  ;;  %v1119_v25 = vrot.slane %v1117_v63, 5  ;;  %v1123_v59 = vrot.slane %v1121_v62, 4  ;;  %v1129_v3 = vrot.slane %v1127_v16, 5 }
  0x80   : > { %v2767_v14 = vrot.slane %v4589_v61, 9  ;;  %v1186_v28 = vrot.slane %v3039_v2, 4  ;;  %v1114_v5 = vor.u32 %v1113_v50, %v1110_v38  ;;  %v2768_v53 = vrot.slane %v3122_v8, 9 }
  0x81   : > { %v3522_v17 = vpack.c.b16 %v1437_v11, %v1436_v33  ;;  %v1191_v56 = vrot.slane %v3124_v9, 5  ;;  %v1124_v27 = vor.u32 %v1123_v59, %v1119_v25  ;;  %v1194_v62 = vrot.slane %v3126_v10, 5 }
  0x82   : > { %v1185_v63 = vsel %vm3516_vm5, %v2767_v14, %v3039_v2  ;;  %v1188_v15 = vsel %vm3516_vm5, %v1186_v28, %v3039_v2  ;;  %v1115_v33 = vrot.slane %v1114_v5, 4  ;;  %v2769_v14 = vrot.slane %v3094_v32, 9 }
  0x83   : > { %1484 = vrot.lane.b32.xlu1 %v3522_v17, %s2967_s13  ;;  %v1490_v16 = vunpack.c.l.b16 %v1185_v63  ;;  %v1491_v11 = vunpack.c.l.b16 %v1188_v15  ;;  %v1192_v38 = vsel %vm3516_vm5, %v2768_v53, %v1191_v56  ;;  %v1125_v50 = vrot.slane %v1124_v27, 4 }
  0x84   : > { %v1193_v59 = vrot.slane %v1191_v56, 4  ;;  %v1492_v61 = vunpack.c.l.b16 %v1192_v38  ;;  %v1120_v55 = vsel %vm3044_vm2, %v1115_v33, %v1119_v25  ;;  %v1198_v10 = vrot.slane %v3097_v39, 5 }
  0x85   : > { %v3540_v2 = vpack.c.b16 %v1491_v11, %v1490_v16  ;;  %v1201_v28 = vrot.slane %v3099_v40, 5  ;;  %v1130_v5 = vsel %vm3044_vm2, %v1125_v50, %v1129_v3  ;;  %v1440_v63 = vunpack.c.l.b16 %v1120_v55 }
  0x86   : > { %v1195_v53 = vsel %vm3516_vm5, %v1193_v59, %v1194_v62  ;;  %v2770_v56 = vrot.slane %v3185_v13, 9  ;;  %v1441_v27 = vunpack.c.l.b16 %v1130_v5  ;;  %v1199_v25 = vsel %vm3516_vm5, %v2769_v14, %v1198_v10 }
  0x87   : > { %4590 = vst [vmem:[#allocation25_spill] sm:$0xff] %v3540_v2  ;;  %v1493_v15 = vunpack.c.l.b16 %v1195_v53  ;;  %v1200_v33 = vrot.slane %v1198_v10, 4  ;;  %v1494_v16 = vunpack.c.l.b16 %v1199_v25  ;;  %v1205_v11 = vrot.slane %v3189_v18, 5 }
  0x88   : > { %v1208_v40 = vrot.slane %v3191_v19, 5  ;;  %v2771_v38 = vrot.slane %v3074_v21, 9  ;;  %v3554_v3 = vpack.c.b16 %v1441_v27, %v1440_v63  ;;  %v1212_v50 = vrot.slane %v3076_v22, 5 }
  0x89   : > { %v3556_v55 = vpack.c.b16 %v1493_v15, %v1492_v61  ;;  %v1202_v62 = vsel %vm3516_vm5, %v1200_v33, %v1201_v28  ;;  %v1206_v14 = vsel %vm3516_vm5, %v2770_v56, %v1205_v11  ;;  %v1207_v10 = vrot.slane %v1205_v11, 4 }
  0x8a   : > { %v1495_v59 = vunpack.c.l.b16 %v1202_v62  ;;  %v1215_v5 = vrot.slane %v3078_v23, 5  ;;  %1488 = vrot.lane.b32.xlu0 %v3554_v3, %s2967_s13  ;;  %v1496_v19 = vunpack.c.l.b16 %v1206_v14  ;;  %v1213_v61 = vsel %vm3516_vm5, %v2771_v38, %v1212_v50  ;;  %s4266_s13 = scalar_lea.vmem %s4518_s7, %s2813_s10 }
  0x8b   : > { %1538 = vrot.lane.b32.xlu1 %v3540_v2, %s2968_s14  ;;  %v1214_v28 = vrot.slane %v1212_v50, 4  ;;  %v2772_v63 = vrot.slane %v3157_v45, 9  ;;  %1540 = vrot.lane.b32.xlu2 %v3556_v55, %s2968_s14  ;;  %v1209_v23 = vsel %vm3516_vm5, %v1207_v10, %v1208_v40  ;;  %v1498_v53 = vunpack.c.l.b16 %v1213_v61  ;;  %v4594_v2 = vld [vmem:[#allocation23_spill] sm:$0xff] }
  0x8c   : > { %v1219_v56 = vrot.slane %v3159_v46, 5  ;;  %v1497_v27 = vunpack.c.l.b16 %v1209_v23  ;;  %v1222_v25 = vrot.slane %v3161_v47, 5  ;;  %v2773_v33 = vrot.slane %v3218_v57, 9 }
  0x8d   : > { %v1216_v15 = vsel %vm3516_vm5, %v1214_v28, %v1215_v5  ;;  %v1226_v50 = vrot.slane %v3220_v58, 5  ;;  %v3583_v14 = vpack.c.b16 %v1495_v59, %v1494_v16  ;;  %v1229_v10 = vrot.slane %v3222_v60, 5 }
  0x8e   : > { %v1499_v11 = vunpack.c.l.b16 %v1216_v15  ;;  %v1220_v38 = vsel %vm3516_vm5, %v2772_v63, %v1219_v56  ;;  %v1221_v62 = vrot.slane %v1219_v56, 4  ;;  %v3585_v40 = vpack.c.b16 %v1497_v27, %v1496_v19 }
  0x8f   : > { %v2774_v61 = vrot.slane %v3279_v26, 9  ;;  %v1227_v28 = vsel %vm3516_vm5, %v2773_v33, %v1226_v50  ;;  %v1228_v63 = vrot.slane %v1226_v50, 4  ;;  %v1500_v23 = vunpack.c.l.b16 %v1220_v38 }
  0x90   : > { %v3589_v5 = vpack.c.b16 %v1499_v11, %v1498_v53  ;;  %v1223_v47 = vsel %vm3516_vm5, %v1221_v62, %v1222_v25  ;;  %v1233_v16 = vrot.slane %v3283_v29, 5  ;;  %v1236_v59 = vrot.slane %v3285_v30, 5 }
  0x91   : > { %v1501_v56 = vunpack.c.l.b16 %v1223_v47  ;;  %v1230_v60 = vsel %vm3516_vm5, %v1228_v63, %v1229_v10  ;;  %v2775_v19 = vrot.slane %v3251_v42, 9  ;;  %v1240_v53 = vrot.slane %v3253_v43, 5 }
  0x92   : > { %4591 = vst [vmem:[#allocation26_spill] sm:$0xff] %v3589_v5  ;;  %v1243_v27 = vrot.slane %v3255_v44, 5  ;;  %1542 = vrot.lane.b32.xlu0 %v3583_v14, %s2968_s14  ;;  %v1502_v15 = vunpack.c.l.b16 %v1227_v28  ;;  %v1503_v25 = vunpack.c.l.b16 %v1230_v60  ;;  %v1234_v30 = vsel %vm3516_vm5, %v2774_v61, %v1233_v16 }
  0x93   : > { %1544 = vrot.lane.b32.xlu1 %v3585_v40, %s2968_s14  ;;  %v1235_v33 = vrot.slane %v1233_v16, 4  ;;  %1546 = vrot.lane.b32.xlu2 %v3589_v5, %s2968_s14  ;;  %v1504_v11 = vunpack.c.l.b16 %v1234_v30  ;;  %v1242_v38 = vrot.slane %v1240_v53, 4  ;;  %v2776_v62 = vrot.slane %v3312_v35, 9 }
  0x94   : > { %v3611_v44 = vpack.c.b16 %v1501_v56, %v1500_v23  ;;  %v1241_v10 = vsel %vm3516_vm5, %v2775_v19, %v1240_v53  ;;  %v1247_v47 = vrot.slane %v3314_v36, 5  ;;  %v1250_v63 = vrot.slane %v3316_v31, 5 }
  0x95   : > { %v1237_v50 = vsel %vm3516_vm5, %v1235_v33, %v1236_v59  ;;  %v1244_v61 = vsel %vm3516_vm5, %v1242_v38, %v1243_v27  ;;  %v2777_v16 = vrot.slane %v3373_v20, 9  ;;  %v3622_v60 = vpack.c.b16 %v1503_v25, %v1502_v15 }
  0x96   : > { %v1505_v28 = vunpack.c.l.b16 %v1237_v50  ;;  %v1248_v23 = vsel %vm3516_vm5, %v2776_v62, %v1247_v47  ;;  %v1249_v56 = vrot.slane %v1247_v47, 4  ;;  %v1254_v59 = vrot.slane %v3377_v51, 5 }
  0x97   : > { %v1506_v19 = vunpack.c.l.b16 %v1241_v10  ;;  %v1507_v53 = vunpack.c.l.b16 %v1244_v61  ;;  %v1257_v33 = vrot.slane %v3379_v52, 5  ;;  %v1508_v31 = vunpack.c.l.b16 %v1248_v23 }
  0x98   : > { %v3627_v30 = vpack.c.b16 %v1505_v28, %v1504_v11  ;;  %v1251_v27 = vsel %vm3516_vm5, %v1249_v56, %v1250_v63  ;;  %v1255_v15 = vsel %vm3516_vm5, %v2777_v16, %v1254_v59  ;;  %v1256_v25 = vrot.slane %v1254_v59, 4  ;;  %v4592_v16 = vld [vmem:[#allocation17_spill] sm:$0xff] }
  0x99   : > { %v1509_v38 = vunpack.c.l.b16 %v1251_v27  ;;  %v1510_v50 = vunpack.c.l.b16 %v1255_v15  ;;  %v2778_v62 = vrot.slane %v3345_v41, 9  ;;  %v1261_v47 = vrot.slane %v3347_v48, 5 }
  0x9a   : > { %1548 = vrot.lane.b32.xlu0 %v3611_v44, %s2968_s14  ;;  %v1258_v52 = vsel %vm3516_vm5, %v1256_v25, %v1257_v33  ;;  %v1264_v11 = vrot.slane %v3349_v49, 5  ;;  %v2779_v10 = vrot.slane %v3406_v24, 9  ;;  %v1268_v28 = vrot.slane %v3408_v1, 5 }
  0x9b   : > { %1550 = vrot.lane.b32.xlu1 %v3622_v60, %s2968_s14  ;;  %1552 = vrot.lane.b32.xlu2 %v3627_v30, %s2968_s14  ;;  %v1511_v61 = vunpack.c.l.b16 %v1258_v52  ;;  %v1263_v63 = vrot.slane %v1261_v47, 4  ;;  %v1271_v23 = vrot.slane %v4592_v16, 5  ;;  %v2780_v59 = vrot.slane %v3467_v0, 9 }
  0x9c   : > { %v1270_v56 = vrot.slane %v1268_v28, 4  ;;  %v3649_v27 = vpack.c.b16 %v1507_v53, %v1506_v19  ;;  %v3651_v15 = vpack.c.b16 %v1509_v38, %v1508_v31  ;;  %v1262_v49 = vsel %vm3516_vm5, %v2778_v62, %v1261_v47  ;;  %v4595_v38 = vld [vmem:[#allocation20_spill] sm:$0xff] }
  0x9d   : > { %v1275_v33 = vrot.slane %v3471_v37, 5  ;;  %v3656_v25 = vpack.c.b16 %v1511_v61, %v1510_v50  ;;  %v1265_v52 = vsel %vm3516_vm5, %v1263_v63, %v1264_v11  ;;  %v1269_v16 = vsel %vm3516_vm5, %v2779_v10, %v1268_v28  ;;  %v4596_v63 = vld [vmem:[#allocation19_spill] sm:$0xff]  ;;  %v4597_v28 = vld [vmem:[#allocation21_spill] sm:$0xff] }
  0x9e   : > { %4593 = vst [vmem:[#allocation17_spill] sm:$0xff] %v3649_v27  ;;  %v1278_v5 = vrot.slane %v4594_v2, 5  ;;  %v1272_v19 = vsel %vm3516_vm5, %v1270_v56, %v1271_v23  ;;  %v1282_v62 = vrot.slane %v4595_v38, 5  ;;  %v1512_v47 = vunpack.c.l.b16 %v1262_v49 }
  0x9f   : > { %v1276_v53 = vsel %vm3516_vm5, %v2780_v59, %v1275_v33  ;;  %v1277_v31 = vrot.slane %v1275_v33, 4  ;;  %v1513_v50 = vunpack.c.l.b16 %v1265_v52  ;;  %v1514_v61 = vunpack.c.l.b16 %v1269_v16 }
  0xa0   : > { %v2781_v4 = vrot.slane %v4596_v63, 9  ;;  %v1515_v2 = vunpack.c.l.b16 %v1272_v19  ;;  %v1516_v10 = vunpack.c.l.b16 %v1276_v53  ;;  %v1285_v23 = vrot.slane %v4597_v28, 5 }
  0xa1   : > { %v1279_v11 = vsel %vm3516_vm5, %v1277_v31, %v1278_v5  ;;  %v1289_v56 = vrot.slane %v3500_v12, 5  ;;  %v1284_v49 = vrot.slane %v1282_v62, 4  ;;  %v2782_v5 = vrot.slane %v3498_v54, 9 }
  0xa2   : > { %1554 = vrot.lane.b32.xlu0 %v3649_v27, %s2968_s14  ;;  %v1517_v59 = vunpack.c.l.b16 %v1279_v11  ;;  %v1292_v33 = vrot.slane %v3502_v6, 5  ;;  %v3681_v16 = vpack.c.b16 %v1513_v50, %v1512_v47  ;;  %v3683_v31 = vpack.c.b16 %v1515_v2, %v1514_v61 }
  0xa3   : > { %1556 = vrot.lane.b32.xlu1 %v3651_v15, %s2968_s14  ;;  %1558 = vrot.lane.b32.xlu2 %v3656_v25, %s2968_s14  ;;  %v1291_v52 = vrot.slane %v1289_v56, 4  ;;  %v1283_v19 = vsel %vm3516_vm5, %v2781_v4, %v1282_v62  ;;  %v1286_v28 = vsel %vm3516_vm5, %v1284_v49, %v1285_v23  ;;  %v1290_v11 = vsel %vm3516_vm5, %v2782_v5, %v1289_v56  ;;  %v3707_v23 = vpop.permute.xlu2 %1466  ;;  %v3717_v49 = vpop.permute.xlu0 %1458 }
  0xa4   : > { %v3687_v53 = vpack.c.b16 %v1517_v59, %v1516_v10  ;;  %v1518_v6 = vunpack.c.l.b16 %v1283_v19  ;;  %v1519_v47 = vunpack.c.l.b16 %v1286_v28  ;;  %v1520_v4 = vunpack.c.l.b16 %v1290_v11 }
  0xa5   : > { %v1293_v27 = vsel %vm3516_vm5, %v1291_v52, %v1292_v33  ;;  %v1364_v50 = vunpack.c.l.b16 %v3122_v8  ;;  %v1365_v61 = vunpack.c.l.b16 %v3124_v9  ;;  %v1366_v59 = vunpack.c.l.b16 %v3094_v32 }
  0xa6   : > { %v1521_v62 = vunpack.c.l.b16 %v1293_v27  ;;  %v3703_v2 = vpack.c.b16 %v1519_v47, %v1518_v6  ;;  %v1367_v27 = vunpack.c.l.b16 %v3097_v39  ;;  %v1368_v8 = vunpack.c.l.b16 %v3185_v13 }
  0xa7   : > { %v1395_v56 = vpack.c.b16 %v1365_v61, %v1364_v50  ;;  %v1369_v9 = vunpack.c.l.b16 %v3189_v18  ;;  %v1388_v5 = vunpack.c.l.b16 %v3467_v0  ;;  %v1370_v32 = vunpack.c.l.b16 %v3074_v21 }
  0xa8   : > { %v3705_v10 = vpack.c.b16 %v1521_v62, %v1520_v4  ;;  %v1371_v33 = vunpack.c.l.b16 %v3076_v22  ;;  %v1389_v52 = vunpack.c.l.b16 %v3471_v37  ;;  %v3726_v39 = vpack.c.b16 %v1367_v27, %v1366_v59 }
  0xa9   : > { %v3728_v13 = vpack.c.b16 %v1369_v9, %v1368_v8  ;;  %v1372_v0 = vunpack.c.l.b16 %v3157_v45  ;;  %v1373_v11 = vunpack.c.l.b16 %v3159_v46  ;;  %vm1780_vm6 = vcmask 31744  }
  0xaa   : > { %1560 = vrot.lane.b32.xlu0 %v3681_v16, %s2968_s14  ;;  %v3724_v19 = vpack.c.b16 %v1389_v52, %v1388_v5  ;;  %v3730_v18 = vpack.c.b16 %v1371_v33, %v1370_v32  ;;  %v1374_v21 = vunpack.c.l.b16 %v3218_v57  ;;  %v1375_v22 = vunpack.c.l.b16 %v3220_v58  ;;  %v509_v5 = vld [vmem:[%s3055_s12 + $0x170] sm:$0xff] }
  0xab   : > { %1562 = vrot.lane.b32.xlu1 %v3683_v31, %s2968_s14  ;;  %1564 = vrot.lane.b32.xlu2 %v3687_v53, %s2968_s14  ;;  %v3732_v28 = vpop.permute.xlu2 %1468  ;;  %v1461_v37 = vpop.permute.xlu0 %1460  ;;  %v1392_v6 = vunpack.c.l.b16 %v3498_v54  ;;  %v1393_v47 = vunpack.c.l.b16 %v3500_v12  ;;  %v1376_v45 = vunpack.c.l.b16 %v3279_v26  ;;  %v1377_v46 = vunpack.c.l.b16 %v3283_v29 }
  0xac   : > { %v3749_v4 = vsel %vm1780_vm6, %v1395_v56, %v1461_v37  ;;  %v3753_v57 = vpack.c.b16 %v1373_v11, %v1372_v0  ;;  %v3755_v58 = vpack.c.b16 %v1375_v22, %v1374_v21  ;;  %v3759_v12 = vpop.permute.xlu1 %1462  ;;  %v1378_v26 = vunpack.c.l.b16 %v3251_v42  ;;  %v508_v42 = vld [vmem:[%s3055_s12 + $0x168] sm:$0xff] }
  0xad   : > { %v3751_v62 = vpack.c.b16 %v1393_v47, %v1392_v6  ;;  %v3757_v54 = vpack.c.b16 %v1377_v46, %v1376_v45  ;;  %v1379_v29 = vunpack.c.l.b16 %v3253_v43  ;;  %v1380_v50 = vunpack.c.l.b16 %v3312_v35 }
  0xae   : > { %v1381_v61 = vunpack.c.l.b16 %v3314_v36  ;;  %v1382_v59 = vunpack.c.l.b16 %v3373_v20  ;;  %v1383_v27 = vunpack.c.l.b16 %v3377_v51  ;;  %vm563_vm7 = vcmp.gt.f32.partialorder %v508_v42, %v3057_v7 }
  0xaf   : > { %v3775_v8 = vpack.c.b16 %v1379_v29, %v1378_v26  ;;  %vm564_vm8 = vcmp.gt.f32.partialorder %v509_v5, %v3057_v7  ;;  %v1384_v35 = vunpack.c.l.b16 %v3345_v41  ;;  %v1385_v36 = vunpack.c.l.b16 %v3347_v48 }
  0xb0   : > { %v3777_v9 = vpack.c.b16 %v1381_v61, %v1380_v50  ;;  %v1404_v43 = vpack.c.b16 %v1383_v27, %v1382_v59  ;;  %v1386_v20 = vunpack.c.l.b16 %v3406_v24  ;;  %v1387_v51 = vunpack.c.l.b16 %v3408_v1  ;;  %v4599_v61 = vld [vmem:[#allocation9_spill] sm:$0xff]  ;;  %v4600_v59 = vld [vmem:[#allocation15_spill] sm:$0xff] }
  0xb1   : > { %v4598_v52 = vmov 0.0   ;;  %v3798_v21 = vpack.c.b16 %v1385_v36, %v1384_v35  ;;  %v1390_v24 = vunpack.c.l.b16 %v4596_v63  ;;  %v1391_v1 = vunpack.c.l.b16 %v4595_v38 }
  0xb2   : > { %1566 = vrot.lane.b32.xlu0 %v3703_v2, %s2968_s14  ;;  %v2758_v0 = vsel %vm563_vm7, 1.0, %v4598_v52  ;;  %v2759_v11 = vsel %vm564_vm8, 1.0, %v4598_v52  ;;  %v3800_v22 = vpack.c.b16 %v1387_v51, %v1386_v20  ;;  %vm1829_vm9 = vcmask 64512   ;;  %v4601_v51 = vld [vmem:[#allocation18_spill] sm:$0xff] }
  0xb3   : > { %1568 = vrot.lane.b32.xlu1 %v3705_v10, %s2968_s14  ;;  %1573 = vrot.lane.b32.xlu2 %v1395_v56, %s2969_s15  ;;  %v3769_v56 = vpop.permute.xlu2 %1474  ;;  %v3802_v41 = vpack.c.bf16 %v2758_v0, %v2758_v0  ;;  %v3804_v48 = vpack.c.bf16 %v2759_v11, %v2759_v11  ;;  %v1408_v47 = vpack.c.b16 %v1391_v1, %v1390_v24  ;;  %v4602_v0 = vld [vmem:[#allocation24_spill] sm:$0xff]  ;;  %v4603_v11 = vmov 0  }
  0xb4   : > { %v1795_v35 = vsel %vm1780_vm6, %v3730_v18, %v3707_v23  ;;  %vm1862_vm10 = vcmask 97280   ;;  %vm2113_vm12 = vcmask 1041408   ;;  %vm1928_vm13 = vcmask 162816  }
  0xb5   : > { %v3792_v32 = vpop.permute.xlu1 %1464  ;;  %v1570_v37 = vunpack.c.l.b16 %v3802_v41  ;;  %v1571_v6 = vunpack.c.l.b16 %v3804_v48  ;;  %vm1961_vm14 = vcmask 195584   ;;  %vm1994_vm15 = vcmask 228352  }
  0xb6   : > { %vm2027_vm0 = vcmask 261120   ;;  %vm2080_vm1 = vcmask 293888   ;;  %vm2374_vm3 = vcmask 1046528  }
  0xb7   : > { %v3816_v26 = vpack.c.b16 %v1571_v6, %v1570_v37 }
  0xba   : > { %1575 = vrot.lane.b32.xlu0 %v3726_v39, %s2969_s15 }
  0xbb   : > { %1577 = vrot.lane.b32.xlu1 %v3728_v13, %s2969_s15  ;;  %1579 = vrot.lane.b32.xlu2 %v3730_v18, %s2969_s15 }
  0xbd   : > { %v1471_v63 = vpop.permute.xlu0 %1470 }
  0xc1   : > { %v3794_v33 = vpop.permute.xlu2 %1480 }
  0xc2   : > { %1581 = vrot.lane.b32.xlu0 %v3753_v57, %s2969_s15 }
  0xc3   : > { %1583 = vrot.lane.b32.xlu1 %v3755_v58, %s2969_s15  ;;  %1585 = vrot.lane.b32.xlu2 %v3757_v54, %s2969_s15 }
  0xca   : > { %1587 = vrot.lane.b32.xlu0 %v3775_v8, %s2969_s15  ;;  %v1473_v45 = vpop.permute.xlu1 %1472 }
  0xcb   : > { %1589 = vrot.lane.b32.xlu1 %v3777_v9, %s2969_s15  ;;  %1591 = vrot.lane.b32.xlu2 %v1404_v43, %s2969_s15  ;;  %v1804_v23 = vsel %vm1780_vm6, %v3757_v54, %v1473_v45 }
  0xd2   : > { %1593 = vrot.lane.b32.xlu0 %v3798_v21, %s2969_s15  ;;  %v1477_v5 = vpop.permute.xlu0 %1476 }
  0xd3   : > { %1595 = vrot.lane.b32.xlu1 %v3800_v22, %s2969_s15  ;;  %1597 = vrot.lane.b32.xlu2 %v3724_v19, %s2969_s15 }
  0xd6   : > { %v1487_v46 = vpop.permute.xlu2 %1486 }
  0xd7   : > { %v3819_v38 = vsel %vm1780_vm6, %v1408_v47, %v1487_v46 }
  0xda   : > { %1599 = vrot.lane.b32.xlu0 %v1408_v47, %s2969_s15 }
  0xdb   : > { %1601 = vrot.lane.b32.xlu1 %v3751_v62, %s2969_s15  ;;  %1603 = vrot.lane.b32.xlu2 %v3816_v26, %s2969_s15 }
  0xe0   : > { %v1479_v29 = vpop.permute.xlu1 %1478 }
  0xe1   : > { %v1813_v50 = vsel %vm1780_vm6, %v1404_v43, %v1479_v29 }
  0xe2   : > { %1608 = vrot.lane.b32.xlu0 %v4599_v61, %s2970_s16 }
  0xe3   : > { %1624 = vrot.lane.b32.xlu1 %v4600_v59, %s2970_s16  ;;  %1632 = vrot.lane.b32.xlu2 %v3522_v17, %s2970_s16 }
  0xe5   : > { %v1541_v27 = vpop.permute.xlu2 %1540 }
  0xe6   : > { %v3835_v42 = vsel %vm1829_vm9, %v3749_v4, %v1541_v27 }
  0xe8   : > { %v1483_v4 = vpop.permute.xlu0 %1482 }
  0xea   : > { %1659 = vrot.lane.b32.xlu0 %v3651_v15, %s2971_s17 }
  0xeb   : > { %1667 = vrot.lane.b32.xlu1 %v3687_v53, %s2971_s17  ;;  %1694 = vrot.lane.b32.xlu2 %v1404_v43, %s2972_s18  ;;  %v1362_v43 = vunpack.c.l.b16 %v4603_v11 }
  0xed   : > { %v1547_v36 = vpop.permute.xlu2 %1546  ;;  %v3859_v6 = vpack.c.b16 %v1362_v43, %v1362_v43 }
  0xee   : > { %v3846_v20 = vsel %vm1829_vm9, %v1795_v35, %v1547_v36  ;;  %v1792_v36 = vsel %vm1780_vm6, %v3728_v13, %v3792_v32  ;;  %v1798_v32 = vsel %vm1780_vm6, %v3753_v57, %v3732_v28  ;;  %v1807_v28 = vsel %vm1780_vm6, %v3775_v8, %v3769_v56 }
  0xef   : > { %v1783_v45 = vsel %vm1780_vm6, %v3859_v6, %v3717_v49  ;;  %v1789_v49 = vsel %vm1780_vm6, %v3726_v39, %v3759_v12  ;;  %v4606_v12 = vld [vmem:[#allocation12_spill] sm:$0xff]  ;;  %v1816_v56 = vsel %vm1780_vm6, %v3798_v21, %v3794_v33 }
  0xf2   : > { %1702 = vrot.lane.b32.xlu0 %v1408_v47, %s2972_s18  ;;  %v4604_v47 = vld [vmem:[#allocation10_spill] sm:$0xff] }
  0xf3   : > { %1729 = vrot.lane.b32.xlu1 %v4601_v51, %s2973_s19  ;;  %1737 = vrot.lane.b32.xlu2 %v4602_v0, %s2973_s19 }
  0xf5   : > { %v1485_v24 = vpop.permute.xlu1 %1484  ;;  %v1553_v1 = vpop.permute.xlu2 %1552 }
  0xf6   : > { %v3857_v37 = vsel %vm1829_vm9, %v1804_v23, %v1553_v1  ;;  %v1822_v43 = vsel %vm1780_vm6, %v3724_v19, %v1485_v24  ;;  %v1801_v24 = vsel %vm1780_vm6, %v3755_v58, %v1471_v63 }
  0xfa   : > { %1764 = vrot.lane.b32.xlu0 %v3656_v25, %s2974_s20 }
  0xfb   : > { %1772 = vrot.lane.b32.xlu1 %v3703_v2, %s2974_s20  ;;  %1616 = vrot.lane.b32.xlu2 %v4604_v47, %s2970_s16 }
  0xfc   : > { %v1489_v46 = vpop.permute.xlu0 %1488 }
  0xfd   : > { %v1539_v29 = vpop.permute.xlu1 %1538  ;;  %v1559_v27 = vpop.permute.xlu2 %1558  ;;  %v1828_v33 = vsel %vm1780_vm6, %v3751_v62, %v1489_v46 }
  0xfe   : > { %v1831_v61 = vsel %vm1829_vm9, %v1783_v45, %v1539_v29  ;;  %v3872_v35 = vsel %vm1829_vm9, %v1813_v50, %v1559_v27 }
 0x102   : > { %1643 = vrot.lane.b32.xlu0 %v3556_v55, %s2971_s17 }
 0x103   : > { %1651 = vrot.lane.b32.xlu1 %v3611_v44, %s2971_s17  ;;  %1678 = vrot.lane.b32.xlu2 %v3726_v39, %s2972_s18  ;;  %v4605_v39 = vld [vmem:[#allocation8_spill] sm:$0xff] }
 0x104   : > { %v1543_v11 = vpop.permute.xlu0 %1542 }
 0x105   : > { %v1545_v50 = vpop.permute.xlu1 %1544  ;;  %v1835_v55 = vsel %vm1829_vm9, %v1789_v49, %v1543_v11  ;;  %v1565_v1 = vpop.permute.xlu2 %1564 }
 0x106   : > { %v1837_v23 = vsel %vm1829_vm9, %v1792_v36, %v1545_v50  ;;  %v3891_v45 = vsel %vm1829_vm9, %v1822_v43, %v1565_v1 }
 0x10a   : > { %1686 = vrot.lane.b32.xlu0 %v3755_v58, %s2972_s18  ;;  %v1810_v58 = vsel %vm1780_vm6, %v3777_v9, %v1477_v5  ;;  %v1819_v5 = vsel %vm1780_vm6, %v3800_v22, %v1483_v4 }
 0x10b   : > { %1713 = vrot.lane.b32.xlu1 %v4605_v39, %s2973_s19  ;;  %1721 = vrot.lane.b32.xlu2 %v4606_v12, %s2973_s19 }
 0x10c   : > { %v1549_v29 = vpop.permute.xlu0 %1548 }
 0x10d   : > { %v1551_v27 = vpop.permute.xlu1 %1550  ;;  %v1841_v49 = vsel %vm1829_vm9, %v1798_v32, %v1549_v29  ;;  %v1574_v11 = vpop.permute.xlu2 %1573 }
 0x10e   : > { %v1843_v36 = vsel %vm1829_vm9, %v1801_v24, %v1551_v27  ;;  %v3907_v50 = vsel %vm1862_vm10, %v1831_v61, %v1574_v11 }
 0x112   : > { %1748 = vrot.lane.b32.xlu0 %v3583_v14, %s2974_s20 }
 0x113   : > { %1756 = vrot.lane.b32.xlu1 %v3622_v60, %s2974_s20  ;;  %1626 = vrot.lane.b32.xlu2 %v4601_v51, %s2970_s16 }
 0x114   : > { %v1555_v63 = vpop.permute.xlu0 %1554 }
 0x115   : > { %v1557_v43 = vpop.permute.xlu1 %1556  ;;  %v3921_v61 = vsel %vm1829_vm9, %v1807_v28, %v1555_v63  ;;  %v1580_v32 = vpop.permute.xlu2 %1579 }
 0x116   : > { %v1849_v1 = vsel %vm1829_vm9, %v1810_v58, %v1557_v43  ;;  %v3925_v24 = vsel %vm1862_vm10, %v1837_v23, %v1580_v32 }
 0x11a   : > { %1634 = vrot.lane.b32.xlu0 %v4602_v0, %s2970_s16 }
 0x11b   : > { %1661 = vrot.lane.b32.xlu1 %v3656_v25, %s2971_s17  ;;  %1669 = vrot.lane.b32.xlu2 %v3703_v2, %s2971_s17  ;;  %v4607_v2 = vld [vmem:[#allocation16_spill] sm:$0xff] }
 0x11c   : > { %v1561_v51 = vpop.permute.xlu0 %1560 }
 0x11d   : > { %v1563_v29 = vpop.permute.xlu1 %1562  ;;  %v3939_v23 = vsel %vm1829_vm9, %v1816_v56, %v1561_v51  ;;  %v1586_v27 = vpop.permute.xlu2 %1585 }
 0x11e   : > { %v3942_v0 = vsel %vm1829_vm9, %v1819_v5, %v1563_v29  ;;  %v3945_v25 = vsel %vm1862_vm10, %v1843_v36, %v1586_v27  ;;  %v1304_v29 = vshll.u32 %v3804_v48, 16  ;;  %v1308_v27 = vshrl.u32 %v3804_v48, 16 }
 0x122   : > { %1696 = vrot.lane.b32.xlu0 %v3798_v21, %s2972_s18 }
 0x123   : > { %1704 = vrot.lane.b32.xlu1 %v3751_v62, %s2972_s18  ;;  %1731 = vrot.lane.b32.xlu2 %v4607_v2, %s2973_s19 }
 0x124   : > { %v1567_v4 = vpop.permute.xlu0 %1566 }
 0x125   : > { %v1569_v11 = vpop.permute.xlu1 %1568  ;;  %v3957_v28 = vsel %vm1829_vm9, %v3819_v38, %v1567_v4  ;;  %v1592_v58 = vpop.permute.xlu2 %1591  ;;  %v4608_v4 = vld [vmem:[#allocation11_spill] sm:$0xff] }
 0x126   : > { %v1861_v36 = vsel %vm1829_vm9, %v1828_v33, %v1569_v11  ;;  %v3961_v21 = vsel %vm1862_vm10, %v1849_v1, %v1592_v58 }
 0x12a   : > { %1739 = vrot.lane.b32.xlu0 %v3554_v3, %s2973_s19 }
 0x12b   : > { %1766 = vrot.lane.b32.xlu1 %v3681_v16, %s2974_s20  ;;  %1774 = vrot.lane.b32.xlu2 %v3705_v10, %s2974_s20 }
 0x12c   : > { %v1576_v62 = vpop.permute.xlu0 %1575 }
 0x12d   : > { %v1578_v46 = vpop.permute.xlu1 %1577  ;;  %v3971_v38 = vsel %vm1862_vm10, %v3835_v42, %v1576_v62  ;;  %v3976_v43 = vpop.permute.xlu2 %1597 }
 0x12e   : > { %v3974_v63 = vsel %vm1862_vm10, %v1835_v55, %v1578_v46 }
 0x132   : > { %1610 = vrot.lane.b32.xlu0 %v4605_v39, %s2970_s16 }
 0x133   : > { %1618 = vrot.lane.b32.xlu1 %v4606_v12, %s2970_s16  ;;  %1645 = vrot.lane.b32.xlu2 %v3583_v14, %s2971_s17  ;;  %v510_v14 = vld [vmem:[%s3055_s12 + $0x178] sm:$0x3] }
 0x134   : > { %v1582_v1 = vpop.permute.xlu0 %1581  ;;  %vm565_vm11 = vcmp.gt.f32.partialorder %v510_v14, %v3057_v7  ;;  %v4609_v7 = vld [vmem:[#allocation14_spill] sm:$0xff] }
 0x135   : > { %v1584_v32 = vpop.permute.xlu1 %1583  ;;  %v3986_v42 = vsel %vm1862_vm10, %v3846_v20, %v1582_v1  ;;  %v1604_v56 = vpop.permute.xlu2 %1603 }
 0x136   : > { %v3989_v55 = vsel %vm1862_vm10, %v1841_v49, %v1584_v32  ;;  %v3992_v5 = vsel %vm1862_vm10, %v1861_v36, %v1604_v56  ;;  %v1306_v32 = vrot.slane %v1304_v29, 5  ;;  %v1310_v56 = vrot.slane %v1308_v27, 4 }
 0x13a   : > { %1653 = vrot.lane.b32.xlu0 %v3622_v60, %s2971_s17  ;;  %v2064_v60 = vld [vmem:[%s4515_s4 + $0x10] sm:$0x3] }
 0x13b   : > { %1680 = vrot.lane.b32.xlu1 %v3728_v13, %s2972_s18  ;;  %1688 = vrot.lane.b32.xlu2 %v3757_v54, %s2972_s18  ;;  %v1295_v13 = vshrl.u32 %v3802_v41, 16  ;;  %v1298_v54 = vshll.u32 %v3802_v41, 16  ;;  %v2074_v51 = vunpack.c.l.b16 %v2064_v60  ;;  %v2815_v60 = vld [vmem:[%s4515_s4 + $0x8] sm:$0xff] }
 0x13c   : > { %v1588_v39 = vpop.permute.xlu0 %1587 }
 0x13d   : > { %v4001_v20 = vpop.permute.xlu1 %1589  ;;  %v4005_v12 = vsel %vm1862_vm10, %v3857_v37, %v1588_v39  ;;  %v4007_v49 = vpop.permute.xlu2 %1632  ;;  %v2760_v37 = vsel %vm565_vm11, 1.0, %v4598_v52  ;;  %v2077_v33 = vpack.c.b16 %v2074_v51, %v2074_v51  ;;  %v1297_v11 = vrot.slane %v1295_v13, 4 }
 0x13e   : > { %v1300_v36 = vrot.slane %v1298_v54, 5  ;;  %v709_v1 = vpack.c.bf16 %v2760_v37, %v2760_v37  ;;  %v1311_v54 = vor.u32 %v1310_v56, %v1306_v32  ;;  %v2783_v56 = vrot.slane %v3802_v41, 9 }
 0x13f   : > { %v2115_v58 = vsel %vm2113_vm12, %v2077_v33, 0  ;;  %v1880_v34 = vsel %vm1862_vm10, %v3921_v61, %v4001_v20 }
 0x140   : > { %2817 = vmatpush.bf16.msra.mxu2 %v2115_v58  ;;  %2818 = vmatpush.bf16.msra.mxu3 %v2115_v58  ;;  %v1301_v13 = vor.u32 %v1300_v36, %v1297_v11  ;;  %v1314_v51 = vshll.u32 %v709_v1, 16  ;;  %v1312_v37 = vrot.slane %v1311_v54, 4 }
 0x141   : > { %2122 = vmatpush.bf16.msra.mxu0 %v2115_v58  ;;  %2816 = vmatpush.bf16.msra.mxu1 %v2115_v58 }
 0x142   : > { %1715 = vrot.lane.b32.xlu0 %v4608_v4, %s2973_s19  ;;  %v1316_v33 = vrot.slane %v1314_v51, 5 }
 0x143   : > { %1723 = vrot.lane.b32.xlu1 %v4609_v7, %s2973_s19  ;;  %1750 = vrot.lane.b32.xlu2 %v3585_v40, %s2974_s20 }
 0x144   : > { %v1594_v62 = vpop.permute.xlu0 %1593  ;;  %2820 = vmatpush.bf16.msra.mxu2 %v2815_v60  ;;  %2821 = vmatpush.bf16.msra.mxu3 %v2815_v60 }
 0x145   : > { %v1596_v46 = vpop.permute.xlu1 %1595  ;;  %v4026_v52 = vsel %vm1862_vm10, %v3872_v35, %v1594_v62  ;;  %v4032_v39 = vpop.permute.xlu2 %1694  ;;  %2123 = vmatpush.bf16.msra.mxu0 %v2815_v60  ;;  %v2814_v35 = vld [vmem:[%s4515_s4] sm:$0xff]  ;;  %2819 = vmatpush.bf16.msra.mxu1 %v2815_v60  ;;  %v1323_v62 = vrot.slane %v3804_v48, 5  ;;  %v1326_v60 = vrot.slane %v709_v1, 5 }
 0x146   : > { %v4030_v14 = vsel %vm1862_vm10, %v3939_v23, %v1596_v46  ;;  %v1302_v23 = vrot.slane %v1301_v13, 4  ;;  %v1317_v46 = vsel %vm3044_vm2, %v1312_v37, %v1316_v33  ;;  %v1888_v37 = vsel %vm1862_vm10, %v3942_v0, %v3976_v43 }
 0x148   : > { %2823 = vmatpush.bf16.msra.mxu2 %v2814_v35  ;;  %2824 = vmatpush.bf16.msra.mxu3 %v2814_v35 }
 0x149   : > { %2124 = vmatpush.bf16.msra.mxu0 %v2814_v35  ;;  %2822 = vmatpush.bf16.msra.mxu1 %v2814_v35 }
 0x14a   : > { %1758 = vrot.lane.b32.xlu0 %v3627_v30, %s2974_s20 }
 0x14b   : > { %1628 = vrot.lane.b32.xlu1 %v4607_v2, %s2970_s16  ;;  %1636 = vrot.lane.b32.xlu2 %v3554_v3, %s2970_s16  ;;  %v1307_v3 = vsel %vm3044_vm2, %v1302_v23, %v1306_v32  ;;  %v1325_v32 = vrot.slane %v1323_v62, 4  ;;  %vm1895_vm2 = vcmask 130048  }
 0x14c   : > { %v1600_v29 = vpop.permute.xlu0 %1599  ;;  %v1921_v61 = vsel %vm1895_vm2, %v1888_v37, %v4007_v49 }
 0x14d   : > { %v1602_v27 = vpop.permute.xlu1 %1601  ;;  %v4048_v11 = vsel %vm1862_vm10, %v3891_v45, %v1600_v29  ;;  %v1738_v36 = vpop.permute.xlu2 %1737  ;;  %v1605_v45 = vunpack.c.l.b16 %v1307_v3 }
 0x14e   : > { %v4052_v2 = vsel %vm1862_vm10, %v3957_v28, %v1602_v27  ;;  %v1606_v28 = vunpack.c.l.b16 %v1317_v46 }
 0x150   : > { %v4066_v51 = vpack.c.b16 %v1606_v28, %v1605_v45 }
 0x152   : > { %1663 = vrot.lane.b32.xlu0 %v3681_v16, %s2971_s17  ;;  %v1324_v16 = vsel %vm3516_vm5, %v2783_v56, %v1323_v62 }
 0x153   : > { %1671 = vrot.lane.b32.xlu1 %v3705_v10, %s2971_s17  ;;  %1698 = vrot.lane.b32.xlu2 %v3800_v22, %s2972_s18  ;;  %v1327_v10 = vsel %vm3516_vm5, %v1325_v32, %v1326_v60  ;;  %v4611_v22 = vld [vmem:[#allocation22_spill] sm:$0xff]  ;;  %v1640_v41 = vunpack.c.l.b16 %v1324_v16  ;;  %v4613_v32 = vld [vmem:[#allocation13_spill] sm:$0xff] }
 0x154   : > { %v1609_v48 = vpop.permute.xlu0 %1608  ;;  %v1641_v35 = vunpack.c.l.b16 %v1327_v10  ;;  %v4614_v60 = vld [vmem:[#allocation26_spill] sm:$0xff] }
 0x155   : > { %v1625_v13 = vpop.permute.xlu1 %1624  ;;  %v1617_v54 = vpop.permute.xlu2 %1616 }
 0x156   : > { %v4078_v27 = vpack.c.b16 %v1641_v35, %v1640_v41  ;;  %v1905_v10 = vsel %vm1895_vm2, %v3986_v42, %v1617_v54 }
 0x15a   : > { %1706 = vrot.lane.b32.xlu0 %v3816_v26, %s2972_s18  ;;  %v1913_v26 = vsel %vm1895_vm2, %v1880_v34, %v1625_v13  ;;  %v4615_v13 = vld [vmem:[#allocation17_spill] sm:$0xff] }
 0x15b   : > { %1733 = vrot.lane.b32.xlu1 %v4611_v22, %s2973_s19  ;;  %1741 = vrot.lane.b32.xlu2 %v4066_v51, %s2973_s19 }
 0x15c   : > { %v1660_v1 = vpop.permute.xlu0 %1659 }
 0x15d   : > { %v1668_v23 = vpop.permute.xlu1 %1667  ;;  %v1679_v29 = vpop.permute.xlu2 %1678  ;;  %v1946_v3 = vsel %vm1928_vm13, %v1913_v26, %v1660_v1 }
 0x15e   : > { %v1954_v62 = vsel %vm1928_vm13, %v1921_v61, %v1668_v23 }
 0x162   : > { %1768 = vrot.lane.b32.xlu0 %v3683_v31, %s2974_s20 }
 0x163   : > { %1776 = vrot.lane.b32.xlu1 %v4078_v27, %s2974_s20  ;;  %1612 = vrot.lane.b32.xlu2 %v4608_v4, %s2970_s16  ;;  %v1979_v4 = vsel %vm1961_vm14, %v1946_v3, %v4032_v39 }
 0x164   : > { %v1703_v33 = vpop.permute.xlu0 %1702 }
 0x165   : > { %v1730_v58 = vpop.permute.xlu1 %1729  ;;  %v1722_v20 = vpop.permute.xlu2 %1721  ;;  %v1987_v46 = vsel %vm1961_vm14, %v1954_v62, %v1703_v33  ;;  %v4616_v33 = vld [vmem:[#allocation6_spill] sm:$0xff]  ;;  %v4617_v62 = vld [vmem:[#allocation25_spill] sm:$0xff] }
 0x166   : > { %v2012_v0 = vsel %vm1994_vm15, %v1979_v4, %v1730_v58  ;;  %v2020_v45 = vsel %vm1994_vm15, %v1987_v46, %v1738_v36 }
 0x16a   : > { %1620 = vrot.lane.b32.xlu0 %v4609_v7, %s2970_s16 }
 0x16b   : > { %1647 = vrot.lane.b32.xlu1 %v3585_v40, %s2971_s17  ;;  %1655 = vrot.lane.b32.xlu2 %v3627_v30, %s2971_s17  ;;  %v4612_v40 = vld [vmem:[#allocation7_spill] sm:$0xff] }
 0x16c   : > { %v1765_v43 = vpop.permute.xlu0 %1764 }
 0x16d   : > { %v1773_v49 = vpop.permute.xlu1 %1772  ;;  %v2045_v28 = vsel %vm2027_vm0, %v2012_v0, %v1765_v43  ;;  %v1627_v39 = vpop.permute.xlu2 %1626 }
 0x16e   : > { %v2053_v56 = vsel %vm2027_vm0, %v2020_v45, %v1773_v49  ;;  %2801 = vmatmul.msk.bf16.vlgmr.msra.gmra.mxu2 %vm2080_vm1, %v2045_v28 }
 0x16f   : > { %2805 = vmatmul.msk.bf16.vlgmr.msra.gmra.mxu3 %vm2080_vm1, %v2053_v56 }
 0x172   : > { %1682 = vrot.lane.b32.xlu0 %v3730_v18, %s2972_s18 }
 0x173   : > { %1690 = vrot.lane.b32.xlu1 %v3775_v8, %s2972_s18  ;;  %1717 = vrot.lane.b32.xlu2 %v4612_v40, %s2973_s19  ;;  %v1897_v8 = vsel %vm1895_vm2, %v3907_v50, %v1609_v48 }
 0x174   : > { %v1644_v30 = vpop.permute.xlu0 %1643 }
 0x175   : > { %v1652_v7 = vpop.permute.xlu1 %1651  ;;  %v1670_v36 = vpop.permute.xlu2 %1669  ;;  %v1930_v35 = vsel %vm1928_vm13, %v1897_v8, %v1644_v30 }
 0x176   : > { %v1938_v1 = vsel %vm1928_vm13, %v1905_v10, %v1652_v7  ;;  %v1963_v34 = vsel %vm1961_vm14, %v1930_v35, %v1679_v29 }
 0x17a   : > { %1725 = vrot.lane.b32.xlu0 %v4613_v32, %s2973_s19 }
 0x17b   : > { %1752 = vrot.lane.b32.xlu1 %v4614_v60, %s2974_s20  ;;  %1760 = vrot.lane.b32.xlu2 %v4615_v13, %s2974_s20 }
 0x17c   : > { %v1687_v16 = vpop.permute.xlu0 %1686 }
 0x17d   : > { %v1714_v18 = vpop.permute.xlu1 %1713  ;;  %v1732_v41 = vpop.permute.xlu2 %1731  ;;  %v1971_v23 = vsel %vm1961_vm14, %v1938_v1, %v1687_v16 }
 0x17e   : > { %v1996_v26 = vsel %vm1994_vm15, %v1963_v34, %v1714_v18  ;;  %v2004_v48 = vsel %vm1994_vm15, %v1971_v23, %v1722_v20 }
 0x182   : > { %1630 = vrot.lane.b32.xlu0 %v4611_v22, %s2970_s16 }
 0x183   : > { %1638 = vrot.lane.b32.xlu1 %v4066_v51, %s2970_s16  ;;  %1665 = vrot.lane.b32.xlu2 %v3683_v31, %s2971_s17 }
 0x184   : > { %v1749_v50 = vpop.permute.xlu0 %1748 }
 0x185   : > { %v1757_v42 = vpop.permute.xlu1 %1756  ;;  %v2029_v54 = vsel %vm2027_vm0, %v1996_v26, %v1749_v50  ;;  %v1775_v37 = vpop.permute.xlu2 %1774 }
 0x186   : > { %v2037_v29 = vsel %vm2027_vm0, %v2004_v48, %v1757_v42  ;;  %2793 = vmatmul.msk.bf16.vlgmr.msra.gmra.mxu0 %vm2080_vm1, %v2029_v54 }
 0x187   : > { %2797 = vmatmul.msk.bf16.vlgmr.msra.gmra.mxu1 %vm2080_vm1, %v2037_v29 }
 0x18a   : > { %1673 = vrot.lane.b32.xlu0 %v4078_v27, %s2971_s17 }
 0x18b   : > { %1700 = vrot.lane.b32.xlu1 %v3724_v19, %s2972_s18  ;;  %1708 = vrot.lane.b32.xlu2 %v3859_v6, %s2972_s18  ;;  %v1915_v19 = vsel %vm1895_vm2, %v3961_v21, %v1627_v39 }
 0x18c   : > { %v1635_v31 = vpop.permute.xlu0 %1634 }
 0x18d   : > { %v1662_v51 = vpop.permute.xlu1 %1661  ;;  %v1646_v22 = vpop.permute.xlu2 %1645  ;;  %v1923_v6 = vsel %vm1895_vm2, %v4048_v11, %v1635_v31 }
 0x18e   : > { %v1948_v20 = vsel %vm1928_vm13, %v1915_v19, %v1662_v51 }
 0x192   : > { %1735 = vrot.lane.b32.xlu0 %v3522_v17, %s2973_s19  ;;  %v1956_v17 = vsel %vm1928_vm13, %v1923_v6, %v1670_v36 }
 0x193   : > { %1743 = vrot.lane.b32.xlu1 %v4616_v33, %s2973_s19  ;;  %1770 = vrot.lane.b32.xlu2 %v3687_v53, %s2974_s20 }
 0x194   : > { %v1697_v58 = vpop.permute.xlu0 %1696 }
 0x195   : > { %v1705_v27 = vpop.permute.xlu1 %1704  ;;  %v1689_v61 = vpop.permute.xlu2 %1688  ;;  %v1981_v3 = vsel %vm1961_vm14, %v1948_v20, %v1697_v58 }
 0x196   : > { %v1989_v53 = vsel %vm1961_vm14, %v1956_v17, %v1705_v27  ;;  %v2014_v11 = vsel %vm1994_vm15, %v1981_v3, %v1732_v41 }
 0x19a   : > { %1778 = vrot.lane.b32.xlu0 %v4617_v62, %s2974_s20 }
 0x19b   : > { %1614 = vrot.lane.b32.xlu1 %v4612_v40, %s2970_s16  ;;  %1622 = vrot.lane.b32.xlu2 %v4613_v32, %s2970_s16 }
 0x19c   : > { %v1740_v21 = vpop.permute.xlu0 %1739 }
 0x19d   : > { %v1767_v46 = vpop.permute.xlu1 %1766  ;;  %v2022_v4 = vsel %vm1994_vm15, %v1989_v53, %v1740_v21  ;;  %v1751_v49 = vpop.permute.xlu2 %1750  ;;  %v2873_v21 = vld [vmem:[%s3055_s12 + $0xc0] sm:$0xff] }
 0x19e   : > { %v2047_v0 = vsel %vm2027_vm0, %v2014_v11, %v1767_v46  ;;  %v2055_v43 = vsel %vm2027_vm0, %v2022_v4, %v1775_v37  ;;  %v2302_v46 = vsel %vm1780_vm6, %v2873_v21, 0.0  ;;  %v2874_v4 = vld [vmem:[%s3055_s12 + $0xc8] sm:$0xff] }
 0x19f   : > { %2802 = vmatmul.msk.bf16.gmra.mxu2 %vm2080_vm1, %v2047_v0  ;;  %2806 = vmatmul.msk.bf16.gmra.mxu3 %vm2080_vm1, %v2055_v43 }
 0x1a2   : > { %1649 = vrot.lane.b32.xlu0 %v4614_v60, %s2971_s17 }
 0x1a3   : > { %1657 = vrot.lane.b32.xlu1 %v4615_v13, %s2971_s17  ;;  %1684 = vrot.lane.b32.xlu2 %v3753_v57, %s2972_s18 }
 0x1a4   : > { %v1611_v45 = vpop.permute.xlu0 %1610 }
 0x1a5   : > { %v1619_v28 = vpop.permute.xlu1 %1618  ;;  %v1637_v39 = vpop.permute.xlu2 %1636  ;;  %v1899_v30 = vsel %vm1895_vm2, %v3971_v38, %v1611_v45  ;;  %v2876_v45 = vld [vmem:[%s3055_s12 + $0x128] sm:$0xff] }
 0x1a6   : > { %v1932_v7 = vsel %vm1928_vm13, %v1899_v30, %v1646_v22  ;;  %v1925_v34 = vsel %vm1895_vm2, %v4052_v2, %v1637_v39  ;;  %v4243_v30 = vld [vmem:[%s4516_s5] ss:$0 sm:$0xff] }
 0x1aa   : > { %1692 = vrot.lane.b32.xlu0 %v3777_v9, %s2972_s18  ;;  %v1907_v9 = vsel %vm1895_vm2, %v3989_v55, %v1619_v28  ;;  %v2315_v28 = vsel %vm1780_vm6, %v2876_v45, 0.0 }
 0x1ab   : > { %1719 = vrot.lane.b32.xlu1 %v4604_v47, %s2973_s19  ;;  %1727 = vrot.lane.b32.xlu2 %v4600_v59, %s2973_s19 }
 0x1ac   : > { %v1654_v56 = vpop.permute.xlu0 %1653 }
 0x1ad   : > { %v1681_v40 = vpop.permute.xlu1 %1680  ;;  %v1699_v47 = vpop.permute.xlu2 %1698  ;;  %v1940_v38 = vsel %vm1928_vm13, %v1907_v9, %v1654_v56 }
 0x1ae   : > { %v1965_v57 = vsel %vm1961_vm14, %v1932_v7, %v1681_v40  ;;  %v2415_v7 = vrot.slane %v2302_v46, 1 }
 0x1b2   : > { %1754 = vrot.lane.b32.xlu0 %v3611_v44, %s2974_s20  ;;  %v1973_v44 = vsel %vm1961_vm14, %v1940_v38, %v1689_v61 }
 0x1b3   : > { %1762 = vrot.lane.b32.xlu1 %v3651_v15, %s2974_s20 }
 0x1b4   : > { %v1716_v59 = vpop.permute.xlu0 %1715 }
 0x1b5   : > { %v1724_v36 = vpop.permute.xlu1 %1723  ;;  %v1998_v32 = vsel %vm1994_vm15, %v1965_v57, %v1716_v59  ;;  %v1742_v18 = vpop.permute.xlu2 %1741 }
 0x1b6   : > { %v2031_v60 = vsel %vm2027_vm0, %v1998_v32, %v1751_v49  ;;  %v2006_v13 = vsel %vm1994_vm15, %v1973_v44, %v1724_v36  ;;  %v2875_v49 = vld [vmem:[%s3055_s12 + $0x120] sm:$0xff] }
 0x1b7   : > { %2794 = vmatmul.msk.bf16.gmra.mxu0 %vm2080_vm1, %v2031_v60  ;;  %v4250_v36 = vld [vmem:[%s4517_s6] ss:$0 sm:$0xff] }
 0x1bc   : > { %v1759_v16 = vpop.permute.xlu0 %1758 }
 0x1bd   : > { %v1629_v15 = vpop.permute.xlu1 %1628  ;;  %v2039_v55 = vsel %vm2027_vm0, %v2006_v13, %v1759_v16  ;;  %v1613_v41 = vpop.permute.xlu2 %1612 }
 0x1be   : > { %2798 = vmatmul.msk.bf16.gmra.mxu1 %vm2080_vm1, %v2039_v55  ;;  %v1917_v35 = vsel %vm1895_vm2, %v4026_v52, %v1629_v15  ;;  %v1901_v61 = vsel %vm1895_vm2, %v3974_v63, %v1613_v41  ;;  %v2303_v63 = vsel %vm1780_vm6, %v2874_v4, 0.0 }
 0x1bf   : > { %v2416_v57 = vrot.slane %v2303_v63, 1 }
 0x1c1   : > { %v2417_v13 = vsel %vm2374_vm3, %v2415_v7, %v2416_v57 }
 0x1c4   : > { %v1664_v8 = vpop.permute.xlu0 %1663 }
 0x1c5   : > { %v1672_v10 = vpop.permute.xlu1 %1671  ;;  %v1950_v26 = vsel %vm1928_vm13, %v1917_v35, %v1664_v8  ;;  %v1656_v42 = vpop.permute.xlu2 %1655  ;;  %v2877_v8 = vld [vmem:[%s3055_s12 + $0xd0] sm:$0x3] }
 0x1c6   : > { %v1958_v50 = vsel %vm1928_vm13, %v1925_v34, %v1672_v10  ;;  %v1983_v54 = vsel %vm1961_vm14, %v1950_v26, %v1699_v47  ;;  %v2436_v47 = vrot.slane %v2315_v28, 1  ;;  %v2304_v10 = vsel %vm1780_vm6, %v2877_v8, 0.0  ;;  %v2878_v35 = vld [vmem:[%s3055_s12 + $0x130] sm:$0x3] }
 0x1c7   : > { %v2418_v26 = vrot.slane %v2304_v10, 1 }
 0x1cc   : > { %v1707_v1 = vpop.permute.xlu0 %1706 }
 0x1cd   : > { %v1734_v23 = vpop.permute.xlu1 %1733  ;;  %v1991_v48 = vsel %vm1961_vm14, %v1958_v50, %v1707_v1  ;;  %v1718_v22 = vpop.permute.xlu2 %1717  ;;  %v2316_v1 = vsel %vm1780_vm6, %v2878_v35, 0.0 }
 0x1ce   : > { %v2016_v37 = vsel %vm1994_vm15, %v1983_v54, %v1734_v23  ;;  %v2024_v52 = vsel %vm1994_vm15, %v1991_v48, %v1742_v18  ;;  %v2438_v50 = vrot.slane %v2316_v1, 1 }
 0x1d4   : > { %v1769_v29 = vpop.permute.xlu0 %1768 }
 0x1d5   : > { %v1777_v31 = vpop.permute.xlu1 %1776  ;;  %v2049_v51 = vsel %vm2027_vm0, %v2016_v37, %v1769_v29  ;;  %v1761_v6 = vpop.permute.xlu2 %1760 }
 0x1d6   : > { %v2057_v2 = vsel %vm2027_vm0, %v2024_v52, %v1777_v31  ;;  %2803 = vmatmul.msk.bf16.gmra.mxu2 %vm2080_vm1, %v2049_v51  ;;  %v2419_v31 = vsel %vm2374_vm3, %v2416_v57, %v2418_v26  ;;  %v2439_v52 = vsel %vm2374_vm3, %v2436_v47, %v2438_v50 }
 0x1d7   : > { %2807 = vmatmul.msk.bf16.gmra.mxu3 %vm2080_vm1, %v2057_v2 }
 0x1dc   : > { %v1621_v33 = vpop.permute.xlu0 %1620 }
 0x1dd   : > { %v1648_v58 = vpop.permute.xlu1 %1647  ;;  %v1909_v20 = vsel %vm1895_vm2, %v3945_v25, %v1621_v33  ;;  %v2314_v25 = vsel %vm1780_vm6, %v2875_v49, 0.0  ;;  %v1666_v59 = vpop.permute.xlu2 %1665 }
 0x1de   : > { %v1934_v3 = vsel %vm1928_vm13, %v1901_v61, %v1648_v58  ;;  %v1942_v62 = vsel %vm1928_vm13, %v1909_v20, %v1656_v42  ;;  %v2435_v9 = vrot.slane %v2314_v25, 1  ;;  %v2879_v58 = vld [vmem:[%s3055_s12] sm:$0xff] }
 0x1e0   : > { %v2437_v16 = vsel %vm2374_vm3, %v2435_v9, %v2436_v47  ;;  %v2883_v47 = vld [vmem:[%s3055_s12 + $0x10] sm:$0x3] }
 0x1e4   : > { %v1683_v27 = vpop.permute.xlu0 %1682 }
 0x1e5   : > { %v1691_v19 = vpop.permute.xlu1 %1690  ;;  %v1967_v17 = vsel %vm1961_vm14, %v1934_v3, %v1683_v27  ;;  %v1709_v29 = vpop.permute.xlu2 %1708  ;;  %v2278_v27 = vsel %vm1780_vm6, %v2879_v58, 0.0 }
 0x1e6   : > { %v1975_v53 = vsel %vm1961_vm14, %v1942_v62, %v1691_v19  ;;  %v2000_v43 = vsel %vm1994_vm15, %v1967_v17, %v1718_v22  ;;  %v2880_v19 = vld [vmem:[%s3055_s12 + $0x8] sm:$0xff]  ;;  %v2375_v46 = vrot.slane %v2278_v27, 1 }
 0x1e7   : > { %v2279_v61 = vsel %vm1780_vm6, %v2880_v19, 0.0  ;;  %v2885_v19 = vld [vmem:[%s3055_s12 + $0xd8] sm:$0xff] }
 0x1ec   : > { %v1726_v11 = vpop.permute.xlu0 %1725 }
 0x1ed   : > { %v1753_v0 = vpop.permute.xlu1 %1752  ;;  %v2008_v39 = vsel %vm1994_vm15, %v1975_v53, %v1726_v11  ;;  %v2882_v53 = vld [vmem:[%s3055_s12 + $0x68] sm:$0xff]  ;;  %v2376_v11 = vrot.slane %v2279_v61, 1  ;;  %v1771_v7 = vpop.permute.xlu2 %1770  ;;  %v2305_v61 = vsel %vm1780_vm6, %v2885_v19, 0.0 }
 0x1ee   : > { %v2033_v56 = vsel %vm2027_vm0, %v2000_v43, %v1753_v0  ;;  %v2041_v40 = vsel %vm2027_vm0, %v2008_v39, %v1761_v6  ;;  %v2881_v6 = vld [vmem:[%s3055_s12 + $0x60] sm:$0xff]  ;;  %v2291_v21 = vsel %vm1780_vm6, %v2882_v53, 0.0 }
 0x1ef   : > { %2795 = vmatmul.msk.bf16.gmra.mxu0 %vm2080_vm1, %v2033_v56  ;;  %2799 = vmatmul.msk.bf16.gmra.mxu1 %vm2080_vm1, %v2041_v40  ;;  %v2290_v20 = vsel %vm1780_vm6, %v2881_v6, 0.0  ;;  %v2396_v0 = vrot.slane %v2291_v21, 1  ;;  %v2377_v28 = vsel %vm2374_vm3, %v2375_v46, %v2376_v11  ;;  %v2886_v6 = vld [vmem:[%s3055_s12 + $0xe0] sm:$0xff] }
 0x1f0   : > { %v2395_v63 = vrot.slane %v2290_v20, 1  ;;  %v2306_v20 = vsel %vm1780_vm6, %v2886_v6, 0.0  ;;  %v2888_v53 = vld [vmem:[%s3055_s12 + $0x140] sm:$0xff]  ;;  %v2895_v6 = vld [vmem:[%s3055_s12 + $0x28] sm:$0x3] }
 0x1f1   : > { %v2166_v32 = vpop.f32.mrf.mxu2  ;;  %v2318_v21 = vsel %vm1780_vm6, %v2888_v53, 0.0 }
 0x1f2   : > { %v2186_v38 = vpop.f32.mrf.mxu3  ;;  %v2226_v60 = vmul.f32 %v4243_v30, %v2166_v32  ;;  %v2397_v9 = vsel %vm2374_vm3, %v2395_v63, %v2396_v0 }
 0x1f3   : > { %v2234_v44 = vmul.f32 %v4243_v30, %v2186_v38 }
 0x1f4   : > { %v2262_v15 = vadd.f32 %v4250_v36, %v2226_v60  ;;  %v1631_v18 = vpop.permute.xlu0 %1630 }
 0x1f5   : > { %v2270_v55 = vadd.f32 %v4250_v36, %v2234_v44  ;;  %v1639_v41 = vpop.permute.xlu1 %1638  ;;  %v1919_v3 = vsel %vm1895_vm2, %v4030_v14, %v1631_v18 }
 0x1f6   : > { %v2503_v23 = vadd.f32 %v2417_v13, %v2262_v15  ;;  %v1952_v4 = vsel %vm1928_vm13, %v1919_v3, %v1666_v59  ;;  %v1927_v14 = vsel %vm1895_vm2, %v3992_v5, %v1639_v41  ;;  %v2280_v5 = vsel %vm1780_vm6, %v2883_v47, 0.0  ;;  %v2884_v59 = vld [vmem:[%s3055_s12 + $0x70] sm:$0x3] }
 0x1f7   : > { %v2511_v34 = vadd.f32 %v2437_v16, %v2270_v55  ;;  %v2292_v32 = vsel %vm1780_vm6, %v2884_v59, 0.0  ;;  %v2378_v55 = vrot.slane %v2280_v5, 1  ;;  %v2889_v5 = vld [vmem:[%s3055_s12 + $0xe8] sm:$0x3] }
 0x1f8   : > { %2535 = vst [vmem:[%s4266_s13 + $0x80] sm:$0xff] %v2503_v23  ;;  %v2398_v8 = vrot.slane %v2292_v32, 1  ;;  %v2307_v59 = vsel %vm1780_vm6, %v2889_v5, 0.0 }
 0x1f9   : > { %2543 = vst [vmem:[%s4266_s13 + $0xc0] sm:$0xff] %v2511_v34  ;;  %v2168_v42 = vpop.f32.mrf.mxu2  ;;  %v2379_v50 = vsel %vm2374_vm3, %v2376_v11, %v2378_v55  ;;  %v2420_v11 = vrot.slane %v2305_v61, 1 }
 0x1fa   : > { %v2188_v48 = vpop.f32.mrf.mxu3  ;;  %v2227_v54 = vmul.f32 %v4243_v30, %v2168_v42 }
 0x1fb   : > { %v2235_v37 = vmul.f32 %v4243_v30, %v2188_v48  ;;  %v2399_v48 = vsel %vm2374_vm3, %v2396_v0, %v2398_v8  ;;  %v2441_v0 = vrot.slane %v2318_v21, 1 }
 0x1fc   : > { %v2263_v51 = vadd.f32 %v4250_v36, %v2227_v54  ;;  %v1674_v2 = vpop.permute.xlu0 %1673 }
 0x1fd   : > { %v2271_v22 = vadd.f32 %v4250_v36, %v2235_v37  ;;  %v1701_v33 = vpop.permute.xlu1 %1700  ;;  %v1960_v38 = vsel %vm1928_vm13, %v1927_v14, %v1674_v2 }
 0x1fe   : > { %v2504_v17 = vadd.f32 %v2419_v31, %v2263_v51  ;;  %v1985_v43 = vsel %vm1961_vm14, %v1952_v4, %v1701_v33  ;;  %v1993_v18 = vsel %vm1961_vm14, %v1960_v38, %v1709_v29  ;;  %v1623_v29 = vpop.permute.xlu2 %1622  ;;  %v2421_v4 = vrot.slane %v2306_v20, 1 }
 0x1ff   : > { %v2512_v62 = vadd.f32 %v2439_v52, %v2271_v22  ;;  %v1911_v3 = vsel %vm1895_vm2, %v4005_v12, %v1623_v29  ;;  %v2283_v20 = vsel %vm1780_vm6, %v2895_v6, 0.0  ;;  %v2903_v6 = vld [vmem:[%s3055_s12 + $0x30] sm:$0xff] }
 0x200   : > { %2536 = vst [vmem:[%s4266_s13 + $0x88] sm:$0xff] %v2504_v17  ;;  %v2887_v17 = vld [vmem:[%s3055_s12 + $0x138] sm:$0xff]  ;;  %v2383_v53 = vrot.slane %v2283_v20, 1  ;;  %v2284_v20 = vsel %vm1780_vm6, %v2903_v6, 0.0 }
 0x201   : > { %2544 = vst [vmem:[%s4266_s13 + $0xc8] sm:$0xff] %v2512_v62  ;;  %v2317_v62 = vsel %vm1780_vm6, %v2887_v17, 0.0 }
 0x202   : > { %v2440_v63 = vrot.slane %v2317_v62, 1 }
 0x203   : > { %v2126_v49 = vpop.f32.mrf.mxu0 }
 0x204   : > { %v2146_v25 = vpop.f32.mrf.mxu1  ;;  %v2210_v45 = vmul.f32 %v4243_v30, %v2126_v49  ;;  %v1736_v39 = vpop.permute.xlu0 %1735 }
 0x205   : > { %v2218_v56 = vmul.f32 %v4243_v30, %v2146_v25  ;;  %v1744_v40 = vpop.permute.xlu1 %1743  ;;  %v2018_v57 = vsel %vm1994_vm15, %v1985_v43, %v1736_v39 }
 0x206   : > { %v2246_v60 = vadd.f32 %v4250_v36, %v2210_v45  ;;  %v2051_v44 = vsel %vm2027_vm0, %v2018_v57, %v1771_v7  ;;  %v2026_v10 = vsel %vm1994_vm15, %v1993_v18, %v1744_v40  ;;  %v1685_v22 = vpop.permute.xlu2 %1684  ;;  %v2442_v7 = vsel %vm2374_vm3, %v2440_v63, %v2441_v0 }
 0x207   : > { %v2254_v13 = vadd.f32 %v4250_v36, %v2218_v56  ;;  %2804 = vmatmul.msk.bf16.gmra.mxu2 %vm2080_vm1, %v2051_v44  ;;  %v2422_v56 = vsel %vm2374_vm3, %v2420_v11, %v2421_v4  ;;  %v2423_v18 = vrot.slane %v2307_v59, 1  ;;  %v2899_v59 = vld [vmem:[%s3055_s12 + $0x150] sm:$0xff] }
 0x208   : > { %v2487_v16 = vadd.f32 %v2377_v28, %v2246_v60  ;;  %v2890_v60 = vld [vmem:[%s3055_s12 + $0x148] sm:$0x3] }
 0x209   : > { %v2495_v15 = vadd.f32 %v2397_v9, %v2254_v13  ;;  %v2319_v44 = vsel %vm1780_vm6, %v2890_v60, 0.0 }
 0x20a   : > { %2519 = vst [vmem:[%s4266_s13] sm:$0xff] %v2487_v16  ;;  %v2443_v55 = vrot.slane %v2319_v44, 1 }
 0x20b   : > { %2527 = vst [vmem:[%s4266_s13 + $0x40] sm:$0xff] %v2495_v15  ;;  %v2128_v41 = vpop.f32.mrf.mxu0 }
 0x20c   : > { %v2148_v35 = vpop.f32.mrf.mxu1  ;;  %v2211_v1 = vmul.f32 %v4243_v30, %v2128_v41  ;;  %v1779_v23 = vpop.permute.xlu0 %1778 }
 0x20d   : > { %v2219_v34 = vmul.f32 %v4243_v30, %v2148_v35  ;;  %v1615_v26 = vpop.permute.xlu1 %1614  ;;  %v2059_v42 = vsel %vm2027_vm0, %v2026_v10, %v1779_v23  ;;  %v2444_v23 = vsel %vm2374_vm3, %v2441_v0, %v2443_v55 }
 0x20e   : > { %v2247_v54 = vadd.f32 %v4250_v36, %v2211_v1  ;;  %2808 = vmatmul.msk.bf16.gmra.mxu3 %vm2080_vm1, %v2059_v42  ;;  %v1903_v33 = vsel %vm1895_vm2, %v3925_v24, %v1615_v26  ;;  %v1728_v12 = vpop.permute.xlu2 %1727  ;;  %v2424_v1 = vsel %vm2374_vm3, %v2421_v4, %v2423_v18 }
 0x20f   : > { %v2255_v37 = vadd.f32 %v4250_v36, %v2219_v34 }
 0x210   : > { %v2488_v31 = vadd.f32 %v2379_v50, %v2247_v54 }
 0x211   : > { %v2496_v52 = vadd.f32 %v2399_v48, %v2255_v37  ;;  %v2891_v48 = vld [vmem:[%s3055_s12 + $0x18] sm:$0xff]  ;;  %v2892_v37 = vld [vmem:[%s3055_s12 + $0x20] sm:$0xff] }
 0x212   : > { %2520 = vst [vmem:[%s4266_s13 + $0x8] sm:$0xff] %v2488_v31  ;;  %v2281_v54 = vsel %vm1780_vm6, %v2891_v48, 0.0  ;;  %v2282_v29 = vsel %vm1780_vm6, %v2892_v37, 0.0 }
 0x213   : > { %2528 = vst [vmem:[%s4266_s13 + $0x48] sm:$0xff] %v2496_v52  ;;  %v2380_v31 = vrot.slane %v2281_v54, 1  ;;  %v2381_v52 = vrot.slane %v2282_v29, 1 }
 0x214   : > { %v1650_v51 = vpop.permute.xlu0 %1649 }
 0x215   : > { %v1658_v2 = vpop.permute.xlu1 %1657  ;;  %v1936_v46 = vsel %vm1928_vm13, %v1903_v33, %v1650_v51  ;;  %v2893_v33 = vld [vmem:[%s3055_s12 + $0x78] sm:$0xff]  ;;  %v2384_v0 = vsel %vm2374_vm3, %v2381_v52, %v2383_v53 }
 0x216   : > { %v1944_v24 = vsel %vm1928_vm13, %v1911_v3, %v1658_v2  ;;  %v1969_v43 = vsel %vm1961_vm14, %v1936_v46, %v1685_v22  ;;  %v2382_v22 = vsel %vm2374_vm3, %v2380_v31, %v2381_v52 }
 0x21c   : > { %v1693_v58 = vpop.permute.xlu0 %1692 }
 0x21d   : > { %v1720_v27 = vpop.permute.xlu1 %1719  ;;  %v1977_v14 = vsel %vm1961_vm14, %v1944_v24, %v1693_v58  ;;  %v2293_v58 = vsel %vm1780_vm6, %v2893_v33, 0.0 }
 0x21e   : > { %v2002_v45 = vsel %vm1994_vm15, %v1969_v43, %v1720_v27  ;;  %v2010_v40 = vsel %vm1994_vm15, %v1977_v14, %v1728_v12  ;;  %v2894_v27 = vld [vmem:[%s3055_s12 + $0x80] sm:$0xff]  ;;  %v2400_v17 = vrot.slane %v2293_v58, 1  ;;  %v2896_v43 = vld [vmem:[%s3055_s12 + $0x88] sm:$0x3] }
 0x21f   : > { %v2294_v19 = vsel %vm1780_vm6, %v2894_v27, 0.0  ;;  %v2295_v14 = vsel %vm1780_vm6, %v2896_v43, 0.0 }
 0x220   : > { %v2401_v62 = vrot.slane %v2294_v19, 1 }
 0x222   : > { %v2171_v49 = vpop.f32.mrf.mxu2  ;;  %v2191_v25 = vpop.f32.mrf.mxu3  ;;  %v2402_v11 = vsel %vm2374_vm3, %v2400_v17, %v2401_v62 }
 0x223   : > { %v2228_v28 = vmul.f32 %v4243_v30, %v2171_v49  ;;  %v2236_v39 = vmul.f32 %v4243_v30, %v2191_v25 }
 0x224   : > { %v1755_v57 = vpop.permute.xlu0 %1754 }
 0x225   : > { %v2264_v9 = vadd.f32 %v4250_v36, %v2228_v28  ;;  %v1763_v47 = vpop.permute.xlu1 %1762  ;;  %v2272_v32 = vadd.f32 %v4250_v36, %v2236_v39  ;;  %v2035_v38 = vsel %vm2027_vm0, %v2002_v45, %v1755_v57  ;;  %v2403_v45 = vrot.slane %v2295_v14, 1  ;;  %v2897_v57 = vld [vmem:[%s3055_s12 + $0xf0] sm:$0xff] }
 0x226   : > { %v2043_v13 = vsel %vm2027_vm0, %v2010_v40, %v1763_v47  ;;  %2796 = vmatmul.msk.bf16.gmra.mxu0 %vm2080_vm1, %v2035_v38  ;;  %v2898_v47 = vld [vmem:[%s3055_s12 + $0xf8] sm:$0xff] }
 0x227   : > { %v2505_v16 = vadd.f32 %v2422_v56, %v2264_v9  ;;  %2800 = vmatmul.msk.bf16.gmra.mxu1 %vm2080_vm1, %v2043_v13  ;;  %v2513_v15 = vadd.f32 %v2442_v7, %v2272_v32  ;;  %v2404_v56 = vsel %vm2374_vm3, %v2401_v62, %v2403_v45  ;;  %v2308_v9 = vsel %vm1780_vm6, %v2897_v57, 0.0  ;;  %v2900_v38 = vld [vmem:[%s3055_s12 + $0x158] sm:$0xff]  ;;  %v2905_v62 = vld [vmem:[%s3055_s12 + $0x90] sm:$0xff] }
 0x228   : > { %v2309_v5 = vsel %vm1780_vm6, %v2898_v47, 0.0  ;;  %v2320_v32 = vsel %vm1780_vm6, %v2899_v59, 0.0  ;;  %v2321_v60 = vsel %vm1780_vm6, %v2900_v38, 0.0  ;;  %v2425_v44 = vrot.slane %v2308_v9, 1 }
 0x229   : > { %2537 = vst [vmem:[%s4266_s13 + $0x90] sm:$0xff] %v2505_v16  ;;  %v2426_v13 = vrot.slane %v2309_v5, 1  ;;  %v2445_v16 = vrot.slane %v2320_v32, 1  ;;  %v2296_v53 = vsel %vm1780_vm6, %v2905_v62, 0.0 }
 0x22a   : > { %2545 = vst [vmem:[%s4266_s13 + $0xd0] sm:$0xff] %v2513_v15  ;;  %v2173_v8 = vpop.f32.mrf.mxu2  ;;  %v2193_v10 = vpop.f32.mrf.mxu3  ;;  %v2446_v15 = vrot.slane %v2321_v60, 1 }
 0x22b   : > { %v2229_v41 = vmul.f32 %v4243_v30, %v2173_v8  ;;  %v2237_v35 = vmul.f32 %v4243_v30, %v2193_v10 }
 0x22d   : > { %v2265_v34 = vadd.f32 %v4250_v36, %v2229_v41  ;;  %v2273_v26 = vadd.f32 %v4250_v36, %v2237_v35  ;;  %v2427_v41 = vsel %vm2374_vm3, %v2425_v44, %v2426_v13  ;;  %v2447_v35 = vsel %vm2374_vm3, %v2445_v16, %v2446_v15 }
 0x22f   : > { %v2506_v50 = vadd.f32 %v2424_v1, %v2265_v34  ;;  %v2514_v42 = vadd.f32 %v2444_v23, %v2273_v26  ;;  %v2901_v34 = vld [vmem:[%s3055_s12 + $0x100] sm:$0x3] }
 0x230   : > { %v2310_v26 = vsel %vm1780_vm6, %v2901_v34, 0.0 }
 0x231   : > { %2538 = vst [vmem:[%s4266_s13 + $0x98] sm:$0xff] %v2506_v50  ;;  %v2902_v50 = vld [vmem:[%s3055_s12 + $0x160] sm:$0x3]  ;;  %v2428_v37 = vrot.slane %v2310_v26, 1 }
 0x232   : > { %2546 = vst [vmem:[%s4266_s13 + $0xd8] sm:$0xff] %v2514_v42  ;;  %v2322_v42 = vsel %vm1780_vm6, %v2902_v50, 0.0 }
 0x233   : > { %v2448_v29 = vrot.slane %v2322_v42, 1  ;;  %v2911_v42 = vld [vmem:[%s3055_s12 + $0x168] sm:$0xff] }
 0x234   : > { %v2131_v51 = vpop.f32.mrf.mxu0 }
 0x235   : > { %v2212_v2 = vmul.f32 %v4243_v30, %v2131_v51  ;;  %v2449_v33 = vsel %vm2374_vm3, %v2446_v15, %v2448_v29 }
 0x237   : > { %v2248_v61 = vadd.f32 %v4250_v36, %v2212_v2 }
 0x239   : > { %v2489_v3 = vadd.f32 %v2382_v22, %v2248_v61  ;;  %v2429_v22 = vsel %vm2374_vm3, %v2426_v13, %v2428_v37 }
 0x23b   : > { %2521 = vst [vmem:[%s4266_s13 + $0x10] sm:$0xff] %v2489_v3  ;;  %v2151_v21 = vpop.f32.mrf.mxu1  ;;  %v2904_v3 = vld [vmem:[%s3055_s12 + $0x38] sm:$0xff] }
 0x23c   : > { %v2220_v46 = vmul.f32 %v4243_v30, %v2151_v21  ;;  %v2133_v24 = vpop.f32.mrf.mxu0  ;;  %v2285_v17 = vsel %vm1780_vm6, %v2904_v3, 0.0  ;;  %v2906_v21 = vld [vmem:[%s3055_s12 + $0x98] sm:$0xff] }
 0x23d   : > { %v2213_v4 = vmul.f32 %v4243_v30, %v2133_v24  ;;  %v2385_v24 = vrot.slane %v2284_v20, 1 }
 0x23e   : > { %v2256_v63 = vadd.f32 %v4250_v36, %v2220_v46  ;;  %v2297_v46 = vsel %vm1780_vm6, %v2906_v21, 0.0 }
 0x23f   : > { %v2249_v12 = vadd.f32 %v4250_v36, %v2213_v4  ;;  %v2405_v4 = vrot.slane %v2296_v53, 1 }
 0x240   : > { %v2497_v49 = vadd.f32 %v2402_v11, %v2256_v63  ;;  %v2386_v11 = vrot.slane %v2285_v17, 1  ;;  %v2406_v63 = vrot.slane %v2297_v46, 1  ;;  %v2914_v17 = vld [vmem:[%s3055_s12 + $0x178] sm:$0x3] }
 0x241   : > { %v2490_v25 = vadd.f32 %v2384_v0, %v2249_v12  ;;  %v2325_v62 = vsel %vm1780_vm6, %v2914_v17, 0.0 }
 0x242   : > { %2529 = vst [vmem:[%s4266_s13 + $0x50] sm:$0xff] %v2497_v49  ;;  %v2387_v49 = vsel %vm2374_vm3, %v2385_v24, %v2386_v11  ;;  %v2453_v24 = vrot.slane %v2325_v62, 1 }
 0x243   : > { %2522 = vst [vmem:[%s4266_s13 + $0x18] sm:$0xff] %v2490_v25  ;;  %v2153_v28 = vpop.f32.mrf.mxu1  ;;  %v2407_v25 = vsel %vm2374_vm3, %v2405_v4, %v2406_v63 }
 0x244   : > { %v2221_v39 = vmul.f32 %v4243_v30, %v2153_v28  ;;  %v2907_v28 = vld [vmem:[%s3055_s12 + $0x40] sm:$0x3] }
 0x246   : > { %v2257_v40 = vadd.f32 %v4250_v36, %v2221_v39  ;;  %v2286_v39 = vsel %vm1780_vm6, %v2907_v28, 0.0 }
 0x247   : > { %v2388_v47 = vrot.slane %v2286_v39, 1  ;;  %v2918_v39 = vld [vmem:[%s3055_s12 + $0xb0] sm:$0xff] }
 0x248   : > { %v2498_v7 = vadd.f32 %v2404_v56, %v2257_v40  ;;  %v2908_v40 = vld [vmem:[%s3055_s12 + $0xa0] sm:$0x3] }
 0x249   : > { %v2389_v44 = vsel %vm2374_vm3, %v2386_v11, %v2388_v47 }
 0x24a   : > { %2530 = vst [vmem:[%s4266_s13 + $0x58] sm:$0xff] %v2498_v7  ;;  %v2298_v7 = vsel %vm1780_vm6, %v2908_v40, 0.0 }
 0x24b   : > { %v2408_v5 = vrot.slane %v2298_v7, 1 }
 0x24d   : > { %v2409_v13 = vsel %vm2374_vm3, %v2406_v63, %v2408_v5 }
 0x259   : > { %v2176_v18 = vpop.f32.mrf.mxu2 }
 0x25a   : > { %v2196_v55 = vpop.f32.mrf.mxu3  ;;  %v2230_v8 = vmul.f32 %v4243_v30, %v2176_v18 }
 0x25b   : > { %v2238_v10 = vmul.f32 %v4243_v30, %v2196_v55 }
 0x25c   : > { %v2266_v1 = vadd.f32 %v4250_v36, %v2230_v8  ;;  %v2909_v8 = vld [vmem:[%s3055_s12 + $0x108] sm:$0xff] }
 0x25d   : > { %v2274_v23 = vadd.f32 %v4250_v36, %v2238_v10  ;;  %v2311_v10 = vsel %vm1780_vm6, %v2909_v8, 0.0 }
 0x25e   : > { %v2507_v48 = vadd.f32 %v2427_v41, %v2266_v1  ;;  %v2910_v41 = vld [vmem:[%s3055_s12 + $0x110] sm:$0xff]  ;;  %v2430_v1 = vrot.slane %v2311_v10, 1 }
 0x25f   : > { %v2515_v54 = vadd.f32 %v2447_v35, %v2274_v23  ;;  %v2312_v35 = vsel %vm1780_vm6, %v2910_v41, 0.0 }
 0x260   : > { %2539 = vst [vmem:[%s4266_s13 + $0xa0] sm:$0xff] %v2507_v48  ;;  %v2431_v23 = vrot.slane %v2312_v35, 1  ;;  %v2323_v48 = vsel %vm1780_vm6, %v2911_v42, 0.0 }
 0x261   : > { %2547 = vst [vmem:[%s4266_s13 + $0xe0] sm:$0xff] %v2515_v54  ;;  %v2178_v31 = vpop.f32.mrf.mxu2  ;;  %v2912_v54 = vld [vmem:[%s3055_s12 + $0x170] sm:$0xff] }
 0x262   : > { %v2198_v52 = vpop.f32.mrf.mxu3  ;;  %v2231_v51 = vmul.f32 %v4243_v30, %v2178_v31  ;;  %v2432_v50 = vsel %vm2374_vm3, %v2430_v1, %v2431_v23  ;;  %v2324_v37 = vsel %vm1780_vm6, %v2912_v54, 0.0  ;;  %v2913_v31 = vld [vmem:[%s3055_s12 + $0x118] sm:$0x3] }
 0x263   : > { %v2239_v2 = vmul.f32 %v4243_v30, %v2198_v52  ;;  %v2313_v52 = vsel %vm1780_vm6, %v2913_v31, 0.0 }
 0x264   : > { %v2267_v58 = vadd.f32 %v4250_v36, %v2231_v51 }
 0x265   : > { %v2275_v27 = vadd.f32 %v4250_v36, %v2239_v2  ;;  %v2450_v2 = vrot.slane %v2323_v48, 1 }
 0x266   : > { %v2508_v19 = vadd.f32 %v2429_v22, %v2267_v58  ;;  %v2451_v22 = vrot.slane %v2324_v37, 1 }
 0x267   : > { %v2516_v61 = vadd.f32 %v2449_v33, %v2275_v27  ;;  %v2433_v33 = vrot.slane %v2313_v52, 1 }
 0x268   : > { %2540 = vst [vmem:[%s4266_s13 + $0xa8] sm:$0xff] %v2508_v19  ;;  %v2454_v63 = vsel %vm2374_vm3, %v2451_v22, %v2453_v24 }
 0x269   : > { %2548 = vst [vmem:[%s4266_s13 + $0xe8] sm:$0xff] %v2516_v61  ;;  %v2452_v61 = vsel %vm2374_vm3, %v2450_v2, %v2451_v22  ;;  %v2434_v3 = vsel %vm2374_vm3, %v2431_v23, %v2433_v33 }
 0x26c   : > { %v2136_v0 = vpop.f32.mrf.mxu0  ;;  %v2156_v43 = vpop.f32.mrf.mxu1 }
 0x26d   : > { %v2214_v14 = vmul.f32 %v4243_v30, %v2136_v0  ;;  %v2222_v12 = vmul.f32 %v4243_v30, %v2156_v43  ;;  %v2915_v43 = vld [vmem:[%s3055_s12 + $0x48] sm:$0xff] }
 0x26f   : > { %v2250_v45 = vadd.f32 %v4250_v36, %v2214_v14  ;;  %v2258_v56 = vadd.f32 %v4250_v36, %v2222_v12  ;;  %v2287_v14 = vsel %vm1780_vm6, %v2915_v43, 0.0 }
 0x270   : > { %v2390_v40 = vrot.slane %v2287_v14, 1 }
 0x271   : > { %v2491_v57 = vadd.f32 %v2387_v49, %v2250_v45  ;;  %v2499_v9 = vadd.f32 %v2407_v25, %v2258_v56  ;;  %v2916_v49 = vld [vmem:[%s3055_s12 + $0x50] sm:$0xff]  ;;  %v2917_v45 = vld [vmem:[%s3055_s12 + $0xa8] sm:$0xff]  ;;  %v2300_v56 = vsel %vm1780_vm6, %v2918_v39, 0.0 }
 0x272   : > { %v2288_v25 = vsel %vm1780_vm6, %v2916_v49, 0.0  ;;  %v2299_v28 = vsel %vm1780_vm6, %v2917_v45, 0.0 }
 0x273   : > { %2523 = vst [vmem:[%s4266_s13 + $0x20] sm:$0xff] %v2491_v57  ;;  %v2391_v7 = vrot.slane %v2288_v25, 1  ;;  %v2410_v57 = vrot.slane %v2299_v28, 1 }
 0x274   : > { %2531 = vst [vmem:[%s4266_s13 + $0x60] sm:$0xff] %v2499_v9  ;;  %v2138_v59 = vpop.f32.mrf.mxu0  ;;  %v2158_v32 = vpop.f32.mrf.mxu1  ;;  %v2411_v9 = vrot.slane %v2300_v56, 1 }
 0x275   : > { %v2215_v38 = vmul.f32 %v4243_v30, %v2138_v59  ;;  %v2223_v60 = vmul.f32 %v4243_v30, %v2158_v32 }
 0x277   : > { %v2251_v16 = vadd.f32 %v4250_v36, %v2215_v38  ;;  %v2259_v15 = vadd.f32 %v4250_v36, %v2223_v60  ;;  %v2392_v38 = vsel %vm2374_vm3, %v2390_v40, %v2391_v7  ;;  %v2412_v60 = vsel %vm2374_vm3, %v2410_v57, %v2411_v9 }
 0x279   : > { %v2492_v18 = vadd.f32 %v2389_v44, %v2251_v16  ;;  %v2500_v55 = vadd.f32 %v2409_v13, %v2259_v15  ;;  %v2919_v16 = vld [vmem:[%s3055_s12 + $0x58] sm:$0x3] }
 0x27a   : > { %v2289_v15 = vsel %vm1780_vm6, %v2919_v16, 0.0 }
 0x27b   : > { %2524 = vst [vmem:[%s4266_s13 + $0x28] sm:$0xff] %v2492_v18  ;;  %v2920_v18 = vld [vmem:[%s3055_s12 + $0xb8] sm:$0x3]  ;;  %v2393_v41 = vrot.slane %v2289_v15, 1 }
 0x27c   : > { %2532 = vst [vmem:[%s4266_s13 + $0x68] sm:$0xff] %v2500_v55  ;;  %v2301_v55 = vsel %vm1780_vm6, %v2920_v18, 0.0 }
 0x27d   : > { %v2413_v35 = vrot.slane %v2301_v55, 1 }
 0x27f   : > { %v2414_v42 = vsel %vm2374_vm3, %v2411_v9, %v2413_v35 }
 0x28a   : > { %v2181_v34 = vpop.f32.mrf.mxu2 }
 0x28b   : > { %v2232_v26 = vmul.f32 %v4243_v30, %v2181_v34 }
 0x28d   : > { %v2268_v29 = vadd.f32 %v4250_v36, %v2232_v26 }
 0x28f   : > { %v2509_v51 = vadd.f32 %v2432_v50, %v2268_v29  ;;  %v2394_v50 = vsel %vm2374_vm3, %v2391_v7, %v2393_v41 }
 0x291   : > { %2541 = vst [vmem:[%s4266_s13 + $0xb0] sm:$0xff] %v2509_v51  ;;  %v2201_v58 = vpop.f32.mrf.mxu3 }
 0x292   : > { %v2240_v27 = vmul.f32 %v4243_v30, %v2201_v58  ;;  %v2183_v19 = vpop.f32.mrf.mxu2 }
 0x293   : > { %v2233_v6 = vmul.f32 %v4243_v30, %v2183_v19 }
 0x294   : > { %v2276_v20 = vadd.f32 %v4250_v36, %v2240_v27 }
 0x295   : > { %v2269_v53 = vadd.f32 %v4250_v36, %v2233_v6 }
 0x296   : > { %v2517_v21 = vadd.f32 %v2452_v61, %v2276_v20 }
 0x297   : > { %v2510_v46 = vadd.f32 %v2434_v3, %v2269_v53 }
 0x298   : > { %2549 = vst [vmem:[%s4266_s13 + $0xf0] sm:$0xff] %v2517_v21 }
 0x299   : > { %2542 = vst [vmem:[%s4266_s13 + $0xb8] sm:$0xff] %v2510_v46  ;;  %v2203_v11 = vpop.f32.mrf.mxu3 }
 0x29a   : > { %v2241_v4 = vmul.f32 %v4243_v30, %v2203_v11 }
 0x29c   : > { %v2277_v0 = vadd.f32 %v4250_v36, %v2241_v4 }
 0x29e   : > { %v2518_v12 = vadd.f32 %v2454_v63, %v2277_v0 }
 0x2a0   : > { %2550 = vst [vmem:[%s4266_s13 + $0xf8] sm:$0xff] %v2518_v12 }
 0x2a3   : > { %v2141_v47 = vpop.f32.mrf.mxu0 }
 0x2a4   : > { %v2161_v5 = vpop.f32.mrf.mxu1  ;;  %v2216_v59 = vmul.f32 %v4243_v30, %v2141_v47 }
 0x2a5   : > { %v2224_v32 = vmul.f32 %v4243_v30, %v2161_v5 }
 0x2a6   : > { %v2252_v44 = vadd.f32 %v4250_v36, %v2216_v59 }
 0x2a7   : > { %v2260_v13 = vadd.f32 %v4250_v36, %v2224_v32 }
 0x2a8   : > { %v2493_v8 = vadd.f32 %v2392_v38, %v2252_v44 }
 0x2a9   : > { %v2501_v10 = vadd.f32 %v2412_v60, %v2260_v13 }
 0x2aa   : > { %2525 = vst [vmem:[%s4266_s13 + $0x30] sm:$0xff] %v2493_v8 }
 0x2ab   : > { %2533 = vst [vmem:[%s4266_s13 + $0x70] sm:$0xff] %v2501_v10  ;;  %v2143_v1 = vpop.f32.mrf.mxu0 }
 0x2ac   : > { %v2163_v23 = vpop.f32.mrf.mxu1  ;;  %v2217_v34 = vmul.f32 %v4243_v30, %v2143_v1 }
 0x2ad   : > { %v2225_v26 = vmul.f32 %v4243_v30, %v2163_v23 }
 0x2ae   : > { %v2253_v48 = vadd.f32 %v4250_v36, %v2217_v34 }
 0x2af   : > { %v2261_v54 = vadd.f32 %v4250_v36, %v2225_v26 }
 0x2b0   : > { %v2494_v37 = vadd.f32 %v2394_v50, %v2253_v48 }
 0x2b1   : > { %v2502_v29 = vadd.f32 %v2414_v42, %v2261_v54 }
 0x2b2   : > { %2526 = vst [vmem:[%s4266_s13 + $0x38] sm:$0xff] %v2494_v37 }
 0x2b3   : > { %2534 = vst [vmem:[%s4266_s13 + $0x78] sm:$0xff] %v2502_v29 }
 0x2b4 PF: > { %s18_s2 = sadd.s32 1, %s2962_s2   ;;  %s4618_s24 = smov %s2958_s25 }
 0x2b5   : > { %p15_p8 = scmp.ge.s32.totalorder %s18_s2, 4   ;;  %s4619_s25 = smov %s4621_s26 }
 0x2b7   :  { %17 = sbr.rel (!%p15_p8) target bundleno = 2 (0x2), region = 89 }
 0x2bc   :  { %2583 = vsyncpa [#allocation3], 1 }
 0x2bd   :  { %2585 = vsyncpa [#allocation3 + $0x1], 1 }

</bundles_post_ra>
